<compile_context>
chip_gen: v5e
topology: v5e:2x2
jax: 0.10.0
libtpu: 0.0.40
codegen_flags: <defaults>
</compile_context>

<pallas_src>
import functools

import jax
import jax.numpy as jnp
from jax.experimental import pallas as pl
from jax.experimental.pallas import tpu as pltpu

LN_EPS = 1e-5
_NEG_INF = -1e30


def _vmem_budget_and_limit():
    """Generation-dependent VMEM budget (v5e/v6e: 128 MiB, v7x: 64 MiB per core)."""
    try:
        cap = int(pltpu.get_tpu_info().vmem_capacity_bytes)
    except Exception:
        cap = 64 * 1024 * 1024               # conservative fallback (v7x per-core)
    limit = min(cap - 4 * 1024 * 1024, 100 * 1024 * 1024)
    budget = int(limit * 0.75)
    return budget, limit


def _estimate_vmem_bytes(tn, m, c, h, cd_itemsize, attn_itemsize):
    f32 = 4
    pos_elems = tn * m * c
    blocks = (2 * pos_elems * f32                                   # pos block (2x buffered)
              + (pos_elems * cd_itemsize if cd_itemsize != f32 else 0)   # in-kernel cast copy
              + 2 * (tn * c + m * c) * f32                          # x, mem blocks
              + 4 * tn * c * f32                                    # out, posout blocks
              + 2 * h * tn * m * attn_itemsize)                     # attn block
    weights = 2 * (7 * c * c * cd_itemsize + 12 * c * f32)
    temps = (6 * tn * c + 2 * m * c + 10 * tn * m) * f32            # q/kv/qp/a + softmax regs
    return blocks + weights + temps


def _choose_tile_n(n, m, c, h, cd_itemsize, attn_itemsize, budget):
    # Tiles must divide N and keep the second-minor block dim layout friendly
    # (multiple of 8, or equal to the full N).
    cands = [d for d in range(n, 0, -1) if n % d == 0 and (d % 8 == 0 or d == n)]
    for t in cands:
        if _estimate_vmem_bytes(t, m, c, h, cd_itemsize, attn_itemsize) <= budget:
            return t
    return cands[-1]


def _rpe_attention_kernel(num_heads, compute_dtype,
                          x_ref, mem_ref, pos_ref,
                          wq_ref, bq_ref, wkv_ref, bkv_ref,
                          wpT_ref, bp_ref, wvp_ref, bvp_ref,
                          wlin_ref, blin_ref, g1_ref, b1_ref,
                          wpos_ref, bpos_ref, g2_ref, b2_ref,
                          out_ref, attn_ref, posout_ref,
                          hid_acc, pos_acc):
    f32 = jnp.float32
    cd = compute_dtype

    x = x_ref[0]                       # (TN, C)
    mem = mem_ref[0]                   # (M, C)
    pos = pos_ref[0]                   # (TN, M, C), original HBM dtype
    TN, C = x.shape
    M = mem.shape[0]
    H = num_heads
    dph = C // H
    scale = 1.0 / float(dph) ** 0.5

    # Cast the big positional block in-kernel (no separate wrapper-side HBM pass).
    pos_cd = pos if pos.dtype == cd else pos.astype(cd)

    def layer_norm(y, g, b):
        mu = jnp.mean(y, axis=-1, keepdims=True)
        d = y - mu
        var = jnp.mean(d * d, axis=-1, keepdims=True)
        return d * jax.lax.rsqrt(var + LN_EPS) * g + b

    # Small projections on the MXU: q and fused k||v (f32 accumulation).
    q = jnp.dot(x.astype(cd), wq_ref[...], preferred_element_type=f32) + bq_ref[...]
    kv = jnp.dot(mem.astype(cd), wkv_ref[...], preferred_element_type=f32) + bkv_ref[...]

    # Global diagonal mask: rows are offset by this N-tile's position within the grid.
    row0 = pl.program_id(1) * TN
    rows = row0 + jax.lax.broadcasted_iota(jnp.int32, (TN, M), 0)
    cols = jax.lax.broadcasted_iota(jnp.int32, (TN, M), 1)
    diag = rows == cols

    for h in range(H):                 # H is small & static -> unrolled
        s0, s1 = h * dph, (h + 1) * dph
        qh = q[:, s0:s1]               # (TN, dph)
        kh = kv[:, s0:s1]              # (M, dph)
        vh = kv[:, C + s0:C + s1]      # (M, dph)

        # e-score: q . k^T on the MXU.
        se = jnp.einsum('nc,mc->nm', qh, kh, preferred_element_type=f32)      # (TN, M)

        # p-score with Wp algebraically folded into q:
        #   p_h = pos @ Wp_h + bp_h  =>  q_h . p_h = pos . (q_h @ Wp_h^T) + q_h . bp_h
        # so the huge positional projection is never materialised.
        qp = jnp.dot(qh, wpT_ref[s0:s1, :], preferred_element_type=f32)        # (TN, C)
        qbp = jnp.sum(qh * bp_ref[:, s0:s1], axis=-1, keepdims=True)           # (TN, 1)
        sp = jnp.einsum('nrk,nmk->nrm', qp.astype(cd)[:, None, :], pos_cd,
                        preferred_element_type=f32)[:, 0, :]                   # (TN, M)
        scores = (se + sp + qbp) * scale

        # Unmasked softmax (exact division; this tensor is a module output).
        mx = jnp.max(scores, axis=-1, keepdims=True)
        e = jnp.exp(scores - mx)
        attn = e / jnp.sum(e, axis=-1, keepdims=True)
        attn_ref[0, h] = attn.astype(attn_ref.dtype)

        # Diagonal-masked softmax with its own row max (robust to a dominant diagonal).
        scores_m = jnp.where(diag, _NEG_INF, scores)
        mx_m = jnp.max(scores_m, axis=-1, keepdims=True)
        e_m = jnp.where(diag, 0.0, jnp.exp(scores_m - mx_m))
        attn_m = e_m / jnp.sum(e_m, axis=-1, keepdims=True)

        # hidden_h = attn @ v_h (MXU), accumulated head-slice-wise into VMEM scratch.
        hid_acc[:, s0:s1] = jnp.dot(attn, vh, preferred_element_type=f32)

        # Positional aggregation with Wvp folded out of the (TN, M, C) stream:
        #   sum_m attn_m * (pos @ Wvp_h + bvp_h)
        #     = (sum_m attn_m * pos) @ Wvp_h + bvp_h     (sum_m attn_m == 1)
        a_h = jnp.einsum('nrm,nmk->nrk', attn_m.astype(cd)[:, None, :], pos_cd,
                         preferred_element_type=f32)[:, 0, :]                  # (TN, C)
        pos_acc[:, s0:s1] = jnp.dot(a_h.astype(cd), wvp_ref[:, s0:s1],
                                    preferred_element_type=f32)

    # ---- RPEAttentionLayer post-processing: linear + residual LayerNorm ----
    hid_lin = jnp.dot(hid_acc[...].astype(cd), wlin_ref[...],
                      preferred_element_type=f32) + blin_ref[...]
    out_ref[0] = layer_norm(hid_lin + x.astype(f32),
                            g1_ref[...], b1_ref[...]).astype(out_ref.dtype)

    pos_states = pos_acc[...] + bvp_ref[...]
    pos_lin = jnp.dot(pos_states.astype(cd), wpos_ref[...],
                      preferred_element_type=f32) + bpos_ref[...]
    posout_ref[0] = layer_norm(pos_lin, g2_ref[...], b2_ref[...]).astype(posout_ref.dtype)


def rpe_attention_layer(params, input_states, memory_states, position_states,
                        num_heads, compute_dtype=jnp.float32,
                        attn_dtype=jnp.float32):
    B, N, C = input_states.shape
    M = memory_states.shape[1]
    H = num_heads
    assert C % H == 0

    cd = jnp.dtype(compute_dtype)
    f32 = jnp.float32

    # Trace-time weight prep: fused k||v, transposed Wp for the q-fold.  No activation
    # casts here -- in particular position_states goes straight to the kernel.
    wq = params["wq"].astype(cd)
    wkv = jnp.concatenate([params["wk"], params["wv"]], axis=1).astype(cd)    # (C, 2C)
    wpT = params["wp"].T.astype(cd)                                           # (C, C)
    wvp = params["wvp"].astype(cd)                                            # (C, C)
    wlin = params["wlin"].astype(cd)
    wpos = params["wpos"].astype(cd)
    bq = params["bq"].reshape(1, C).astype(f32)
    bkv = jnp.concatenate([params["bk"], params["bv"]], 0).reshape(1, 2 * C).astype(f32)
    bp = params["bp"].reshape(1, C).astype(f32)
    bvp = params["bvp"].reshape(1, C).astype(f32)
    blin = params["blin"].reshape(1, C).astype(f32)
    bpos = params["bpos"].reshape(1, C).astype(f32)
    g1 = params["ln_g"].reshape(1, C).astype(f32)
    b1 = params["ln_b"].reshape(1, C).astype(f32)
    g2 = params["lnp_g"].reshape(1, C).astype(f32)
    b2 = params["lnp_b"].reshape(1, C).astype(f32)
    weights = [wq, bq, wkv, bkv, wpT, bp, wvp, bvp, wlin, blin, g1, b1,
               wpos, bpos, g2, b2]

    budget, vmem_limit = _vmem_budget_and_limit()
    TN = _choose_tile_n(N, M, C, H, cd.itemsize, jnp.dtype(attn_dtype).itemsize, budget)
    grid = (B, N // TN)

    def rep(shape):
        nd = len(shape)
        return pl.BlockSpec(shape, lambda b, n, nd=nd: (0,) * nd)

    in_specs = [
        pl.BlockSpec((1, TN, C), lambda b, n: (b, n, 0)),
        pl.BlockSpec((1, M, C), lambda b, n: (b, 0, 0)),        # resident across N tiles
        pl.BlockSpec((1, TN, M, C), lambda b, n: (b, n, 0, 0)),
    ] + [rep(w.shape) for w in weights]

    out_specs = [
        pl.BlockSpec((1, TN, C), lambda b, n: (b, n, 0)),
        pl.BlockSpec((1, H, TN, M), lambda b, n: (b, 0, n, 0)),
        pl.BlockSpec((1, TN, C), lambda b, n: (b, n, 0)),
    ]
    out_shape = (
        jax.ShapeDtypeStruct((B, N, C), f32),
        jax.ShapeDtypeStruct((B, H, N, M), jnp.dtype(attn_dtype)),
        jax.ShapeDtypeStruct((B, N, C), f32),
    )

    kernel = functools.partial(_rpe_attention_kernel, H, cd)

    return pl.pallas_call(
        kernel,
        out_shape=out_shape,
        grid_spec=pltpu.PrefetchScalarGridSpec(
            num_scalar_prefetch=0,
            grid=grid,
            in_specs=in_specs,
            out_specs=out_specs,
            scratch_shapes=[pltpu.VMEM((TN, C), f32),
                            pltpu.VMEM((TN, C), f32)],
        ),
        compiler_params=pltpu.CompilerParams(
            dimension_semantics=("parallel", "parallel"),
            vmem_limit_bytes=vmem_limit,
        ),
    )(input_states, memory_states, position_states, *weights)


def init_params(key, d_model):
    C = d_model
    ks = jax.random.split(key, 18)

    def w(k, shape, s=0.05):
        return s * jax.random.normal(k, shape, jnp.float32)

    return dict(
        wq=w(ks[0], (C, C)), bq=w(ks[1], (C,)),
        wk=w(ks[2], (C, C)), bk=w(ks[3], (C,)),
        wv=w(ks[4], (C, C)), bv=w(ks[5], (C,)),
        wp=w(ks[6], (C, C)), bp=w(ks[7], (C,)),
        wvp=w(ks[8], (C, C)), bvp=w(ks[9], (C,)),
        wlin=w(ks[10], (C, C)), blin=w(ks[11], (C,)),
        ln_g=1.0 + 0.1 * jax.random.normal(ks[12], (C,), jnp.float32),
        ln_b=w(ks[13], (C,)),
        wpos=w(ks[14], (C, C)), bpos=w(ks[15], (C,)),
        lnp_g=1.0 + 0.1 * jax.random.normal(ks[16], (C,), jnp.float32),
        lnp_b=w(ks[17], (C,)),
    )


def ref_forward(params, x, mem, pos, num_heads):
    """Pure-JAX mirror of the PyTorch RPEAttentionLayer.forward (optional args = None)."""
    B, N, C = x.shape
    M = mem.shape[1]
    H = num_heads
    dph = C // H

    def lin(y, w, b):
        return y @ w + b

    def ln(y, g, b):
        mu = y.mean(-1, keepdims=True)
        var = ((y - mu) ** 2).mean(-1, keepdims=True)
        return (y - mu) / jnp.sqrt(var + LN_EPS) * g + b

    q = lin(x, params["wq"], params["bq"])
    k = lin(mem, params["wk"], params["bk"])
    v = lin(mem, params["wv"], params["bv"])
    p = lin(pos, params["wp"], params["bp"])
    vp = lin(pos, params["wvp"], params["bvp"])

    qh = q.reshape(B, N, H, dph).transpose(0, 2, 1, 3)
    kh = k.reshape(B, M, H, dph).transpose(0, 2, 1, 3)
    vh = v.reshape(B, M, H, dph).transpose(0, 2, 1, 3)
    ph = p.reshape(B, N, M, H, dph).transpose(0, 3, 1, 2, 4)
    vph = vp.reshape(B, N, M, H, dph).transpose(0, 3, 1, 2, 4)

    se = jnp.einsum('bhnc,bhmc->bhnm', qh, kh)
    sp = jnp.einsum('bhnc,bhnmc->bhnm', qh, ph)
    scores = (se + sp) / dph ** 0.5
    diag = jnp.eye(N, M, dtype=bool)

    attn = jax.nn.softmax(scores, axis=-1)
    attn_m = jax.nn.softmax(jnp.where(diag[None, None], -jnp.inf, scores), axis=-1)

    hidden = jnp.einsum('bhnm,bhmc->bhnc', attn, vh)
    hidden = hidden.transpose(0, 2, 1, 3).reshape(B, N, C)
    pos_states = jnp.einsum('bhnm,bhnmc->bhnc', attn_m, vph)
    pos_states = pos_states.transpose(0, 2, 1, 3).reshape(B, N, C)

    out = ln(lin(hidden, params["wlin"], params["blin"]) + x,
             params["ln_g"], params["ln_b"])
    pos_out = ln(lin(pos_states, params["wpos"], params["bpos"]),
                 params["lnp_g"], params["lnp_b"])
    return out, attn, pos_out


if __name__ == "__main__":
    B, N, M, C, H = 2, 8, 8, 32, 2
    key = jax.random.PRNGKey(0)
    k1, k2, k3, kp = jax.random.split(key, 4)
    input_states = jax.random.normal(k1, (B, N, C), jnp.float32)
    memory_states = jax.random.normal(k2, (B, M, C), jnp.float32)
    position_states = jax.random.normal(k3, (B, N, M, C), jnp.float32)
    params = init_params(kp, C)

    out, attn, pos_out = rpe_attention_layer(
        params, input_states, memory_states, position_states, H)
    jax.block_until_ready((out, attn, pos_out))

    ro, ra, rp = ref_forward(params, input_states, memory_states, position_states, H)
    for name, got, ref in (("out", out, ro), ("attn", attn, ra), ("pos", pos_out, rp)):
        err = float(jnp.max(jnp.abs(got - ref)))
        assert err < 2e-3, (name, err)

    print("KERNEL_OK")
</pallas_src>

<mosaic_0001>
module attributes {stable_mosaic.version = 11 : i64} {
  func.func @_rpe_attention_kernel(%arg0: i32, %arg1: i32, %arg2: memref<1x8x32xf32, #tpu.memory_space<vmem>>, %arg3: memref<1x8x32xf32, #tpu.memory_space<vmem>>, %arg4: memref<1x8x8x32xf32, #tpu.memory_space<vmem>>, %arg5: memref<32x32xf32, #tpu.memory_space<vmem>>, %arg6: memref<1x32xf32, #tpu.memory_space<vmem>>, %arg7: memref<32x64xf32, #tpu.memory_space<vmem>>, %arg8: memref<1x64xf32, #tpu.memory_space<vmem>>, %arg9: memref<32x32xf32, #tpu.memory_space<vmem>>, %arg10: memref<1x32xf32, #tpu.memory_space<vmem>>, %arg11: memref<32x32xf32, #tpu.memory_space<vmem>>, %arg12: memref<1x32xf32, #tpu.memory_space<vmem>>, %arg13: memref<32x32xf32, #tpu.memory_space<vmem>>, %arg14: memref<1x32xf32, #tpu.memory_space<vmem>>, %arg15: memref<1x32xf32, #tpu.memory_space<vmem>>, %arg16: memref<1x32xf32, #tpu.memory_space<vmem>>, %arg17: memref<32x32xf32, #tpu.memory_space<vmem>>, %arg18: memref<1x32xf32, #tpu.memory_space<vmem>>, %arg19: memref<1x32xf32, #tpu.memory_space<vmem>>, %arg20: memref<1x32xf32, #tpu.memory_space<vmem>>, %arg21: memref<1x8x32xf32, #tpu.memory_space<vmem>>, %arg22: memref<1x2x8x8xf32, #tpu.memory_space<vmem>>, %arg23: memref<1x8x32xf32, #tpu.memory_space<vmem>>, %arg24: memref<8x32xf32, #tpu.memory_space<vmem>>, %arg25: memref<8x32xf32, #tpu.memory_space<vmem>>) attributes {dimension_semantics = [#tpu.dimension_semantics<parallel>, #tpu.dimension_semantics<parallel>], iteration_bounds = array<i64: 2, 1>, scalar_prefetch = 0 : i64, scratch_operands = 2 : i64, tpu.core_type = #tpu.core_type<tc>, window_params = [{transform_indices = @transform_0, window_bounds = array<i64: 1, 8, 32>}, {transform_indices = @transform_1, window_bounds = array<i64: 1, 8, 32>}, {transform_indices = @transform_2, window_bounds = array<i64: 1, 8, 8, 32>}, {pipeline_mode = #tpu.pipeline_mode<synchronous>, transform_indices = @transform_3, window_bounds = array<i64: 32, 32>}, {pipeline_mode = #tpu.pipeline_mode<synchronous>, transform_indices = @transform_4, window_bounds = array<i64: 1, 32>}, {pipeline_mode = #tpu.pipeline_mode<synchronous>, transform_indices = @transform_5, window_bounds = array<i64: 32, 64>}, {pipeline_mode = #tpu.pipeline_mode<synchronous>, transform_indices = @transform_6, window_bounds = array<i64: 1, 64>}, {pipeline_mode = #tpu.pipeline_mode<synchronous>, transform_indices = @transform_7, window_bounds = array<i64: 32, 32>}, {pipeline_mode = #tpu.pipeline_mode<synchronous>, transform_indices = @transform_8, window_bounds = array<i64: 1, 32>}, {pipeline_mode = #tpu.pipeline_mode<synchronous>, transform_indices = @transform_9, window_bounds = array<i64: 32, 32>}, {pipeline_mode = #tpu.pipeline_mode<synchronous>, transform_indices = @transform_10, window_bounds = array<i64: 1, 32>}, {pipeline_mode = #tpu.pipeline_mode<synchronous>, transform_indices = @transform_11, window_bounds = array<i64: 32, 32>}, {pipeline_mode = #tpu.pipeline_mode<synchronous>, transform_indices = @transform_12, window_bounds = array<i64: 1, 32>}, {pipeline_mode = #tpu.pipeline_mode<synchronous>, transform_indices = @transform_13, window_bounds = array<i64: 1, 32>}, {pipeline_mode = #tpu.pipeline_mode<synchronous>, transform_indices = @transform_14, window_bounds = array<i64: 1, 32>}, {pipeline_mode = #tpu.pipeline_mode<synchronous>, transform_indices = @transform_15, window_bounds = array<i64: 32, 32>}, {pipeline_mode = #tpu.pipeline_mode<synchronous>, transform_indices = @transform_16, window_bounds = array<i64: 1, 32>}, {pipeline_mode = #tpu.pipeline_mode<synchronous>, transform_indices = @transform_17, window_bounds = array<i64: 1, 32>}, {pipeline_mode = #tpu.pipeline_mode<synchronous>, transform_indices = @transform_18, window_bounds = array<i64: 1, 32>}, {transform_indices = @transform_19, window_bounds = array<i64: 1, 8, 32>}, {transform_indices = @transform_20, window_bounds = array<i64: 1, 2, 8, 8>}, {transform_indices = @transform_21, window_bounds = array<i64: 1, 8, 32>}]} {
    %c0 = arith.constant 0 : index
    %c0_0 = arith.constant 0 : index
    %c0_1 = arith.constant 0 : index
    %0 = vector.load %arg2[%c0, %c0_0, %c0_1] : memref<1x8x32xf32, #tpu.memory_space<vmem>>, vector<1x8x32xf32>
    %1 = vector.shape_cast %0 : vector<1x8x32xf32> to vector<8x32xf32>
    %c0_2 = arith.constant 0 : index
    %c0_3 = arith.constant 0 : index
    %c0_4 = arith.constant 0 : index
    %2 = vector.load %arg3[%c0_2, %c0_3, %c0_4] : memref<1x8x32xf32, #tpu.memory_space<vmem>>, vector<1x8x32xf32>
    %3 = vector.shape_cast %2 : vector<1x8x32xf32> to vector<8x32xf32>
    %c0_5 = arith.constant 0 : index
    %c0_6 = arith.constant 0 : index
    %c0_7 = arith.constant 0 : index
    %c0_8 = arith.constant 0 : index
    %4 = vector.load %arg4[%c0_5, %c0_6, %c0_7, %c0_8] : memref<1x8x8x32xf32, #tpu.memory_space<vmem>>, vector<1x8x8x32xf32>
    %5 = vector.shape_cast %4 : vector<1x8x8x32xf32> to vector<8x8x32xf32>
    %c0_9 = arith.constant 0 : index
    %c0_10 = arith.constant 0 : index
    %6 = vector.load %arg5[%c0_9, %c0_10] : memref<32x32xf32, #tpu.memory_space<vmem>>, vector<32x32xf32>
    %cst = arith.constant dense<0.000000e+00> : vector<8x32xf32>
    %7 = tpu.matmul %1, %6, %cst {dimension_numbers = #tpu.dot_dimension_numbers<[1], [0], [0], [1], [0, 0, 1, 1], [], []>} : vector<8x32xf32>, vector<32x32xf32>, vector<8x32xf32> -> vector<8x32xf32>
    %c0_11 = arith.constant 0 : index
    %c0_12 = arith.constant 0 : index
    %8 = vector.load %arg6[%c0_11, %c0_12] : memref<1x32xf32, #tpu.memory_space<vmem>>, vector<1x32xf32>
    %9 = vector.broadcast %8 : vector<1x32xf32> to vector<8x32xf32>
    %10 = arith.addf %7, %9 : vector<8x32xf32>
    %c0_13 = arith.constant 0 : index
    %c0_14 = arith.constant 0 : index
    %11 = vector.load %arg7[%c0_13, %c0_14] : memref<32x64xf32, #tpu.memory_space<vmem>>, vector<32x64xf32>
    %cst_15 = arith.constant dense<0.000000e+00> : vector<8x64xf32>
    %12 = tpu.matmul %3, %11, %cst_15 {dimension_numbers = #tpu.dot_dimension_numbers<[1], [0], [0], [1], [0, 0, 1, 1], [], []>} : vector<8x32xf32>, vector<32x64xf32>, vector<8x64xf32> -> vector<8x64xf32>
    %c0_16 = arith.constant 0 : index
    %c0_17 = arith.constant 0 : index
    %13 = vector.load %arg8[%c0_16, %c0_17] : memref<1x64xf32, #tpu.memory_space<vmem>>, vector<1x64xf32>
    %14 = vector.broadcast %13 : vector<1x64xf32> to vector<8x64xf32>
    %15 = arith.addf %12, %14 : vector<8x64xf32>
    %c8_i32 = arith.constant 8 : i32
    %16 = arith.muli %arg1, %c8_i32 : i32
    %17 = tpu.iota {dimensions = array<i32: 0>} : vector<8x8xi32>
    %18 = vector.broadcast %16 : i32 to vector<8x8xi32>
    %19 = arith.addi %18, %17 : vector<8x8xi32>
    %20 = tpu.iota {dimensions = array<i32: 1>} : vector<8x8xi32>
    %21 = arith.cmpi eq, %19, %20 : vector<8x8xi32>
    %22 = vector.extract_strided_slice %10 {offsets = [0, 0], sizes = [8, 16], strides = [1, 1]} : vector<8x32xf32> to vector<8x16xf32>
    %23 = vector.extract_strided_slice %15 {offsets = [0, 0], sizes = [8, 16], strides = [1, 1]} : vector<8x64xf32> to vector<8x16xf32>
    %24 = vector.extract_strided_slice %15 {offsets = [0, 32], sizes = [8, 16], strides = [1, 1]} : vector<8x64xf32> to vector<8x16xf32>
    "tpu.trace_start"() <{level = 10 : i32, message = "nc,mc->nm"}> : () -> ()
    %cst_18 = arith.constant dense<0.000000e+00> : vector<8x8xf32>
    %25 = tpu.matmul %22, %23, %cst_18 {dimension_numbers = #tpu.dot_dimension_numbers<[1], [1], [0], [0], [0, 0, 1, 0], [], []>} : vector<8x16xf32>, vector<8x16xf32>, vector<8x8xf32> -> vector<8x8xf32>
    "tpu.trace_stop"() : () -> ()
    %c0_19 = arith.constant 0 : index
    %c0_20 = arith.constant 0 : index
    %26 = vector.load %arg9[%c0_19, %c0_20] : memref<32x32xf32, #tpu.memory_space<vmem>>, vector<16x32xf32>
    %cst_21 = arith.constant dense<0.000000e+00> : vector<8x32xf32>
    %27 = tpu.matmul %22, %26, %cst_21 {dimension_numbers = #tpu.dot_dimension_numbers<[1], [0], [0], [1], [0, 0, 1, 1], [], []>} : vector<8x16xf32>, vector<16x32xf32>, vector<8x32xf32> -> vector<8x32xf32>
    %c0_22 = arith.constant 0 : index
    %c0_23 = arith.constant 0 : index
    %28 = vector.load %arg10[%c0_22, %c0_23] : memref<1x32xf32, #tpu.memory_space<vmem>>, vector<1x16xf32>
    %29 = vector.broadcast %28 : vector<1x16xf32> to vector<8x16xf32>
    %30 = arith.mulf %22, %29 : vector<8x16xf32>
    %cst_24 = arith.constant dense<0.000000e+00> : vector<8xf32>
    %31 = vector.multi_reduction <add>, %30, %cst_24 [1] : vector<8x16xf32> to vector<8xf32>
    %32 = vector.shape_cast %31 : vector<8xf32> to vector<8x1xf32>
    %33 = vector.shape_cast %27 : vector<8x32xf32> to vector<8x1x32xf32>
    "tpu.trace_start"() <{level = 10 : i32, message = "nrk,nmk->nrm"}> : () -> ()
    %cst_25 = arith.constant dense<0.000000e+00> : vector<8x1x8xf32>
    %34 = tpu.matmul %33, %5, %cst_25 {dimension_numbers = #tpu.dot_dimension_numbers<[2], [2], [1], [1], [0, 0, 0, 1, 1, 1], [0], [0]>} : vector<8x1x32xf32>, vector<8x8x32xf32>, vector<8x1x8xf32> -> vector<8x1x8xf32>
    "tpu.trace_stop"() : () -> ()
    %35 = vector.shape_cast %34 : vector<8x1x8xf32> to vector<8x8xf32>
    %36 = arith.addf %25, %35 : vector<8x8xf32>
    %37 = vector.broadcast %32 : vector<8x1xf32> to vector<8x8xf32>
    %38 = arith.addf %36, %37 : vector<8x8xf32>
    %cst_26 = arith.constant 2.500000e-01 : f32
    %39 = vector.broadcast %cst_26 : f32 to vector<8x8xf32>
    %40 = arith.mulf %38, %39 : vector<8x8xf32>
    %cst_27 = arith.constant dense<0xFF800000> : vector<8xf32>
    %41 = vector.multi_reduction <maximumf>, %40, %cst_27 [1] : vector<8x8xf32> to vector<8xf32>
    %42 = vector.shape_cast %41 : vector<8xf32> to vector<8x1xf32>
    %43 = vector.broadcast %42 : vector<8x1xf32> to vector<8x8xf32>
    %44 = arith.subf %40, %43 : vector<8x8xf32>
    %45 = math.exp %44 : vector<8x8xf32>
    %cst_28 = arith.constant dense<0.000000e+00> : vector<8xf32>
    %46 = vector.multi_reduction <add>, %45, %cst_28 [1] : vector<8x8xf32> to vector<8xf32>
    %47 = vector.shape_cast %46 : vector<8xf32> to vector<8x1xf32>
    %48 = vector.broadcast %47 : vector<8x1xf32> to vector<8x8xf32>
    %49 = arith.divf %45, %48 : vector<8x8xf32>
    %c0_29 = arith.constant 0 : index
    %c0_30 = arith.constant 0 : index
    %c0_31 = arith.constant 0 : index
    %c0_32 = arith.constant 0 : index
    %50 = vector.load %arg22[%c0_29, %c0_30, %c0_31, %c0_32] : memref<1x2x8x8xf32, #tpu.memory_space<vmem>>, vector<1x1x8x8xf32>
    %51 = vector.shape_cast %50 : vector<1x1x8x8xf32> to vector<8x8xf32>
    %52 = vector.shape_cast %49 : vector<8x8xf32> to vector<1x1x8x8xf32>
    tpu.vector_store %arg22[%c0_29, %c0_30, %c0_31, %c0_32], %52 {strides = array<i32>} : memref<1x2x8x8xf32, #tpu.memory_space<vmem>>, vector<1x1x8x8xf32>,
    %cst_33 = arith.constant -1.000000e+30 : f32
    %53 = vector.broadcast %cst_33 : f32 to vector<8x8xf32>
    %54 = arith.select %21, %53, %40 : vector<8x8xi1>, vector<8x8xf32>
    %cst_34 = arith.constant dense<0xFF800000> : vector<8xf32>
    %55 = vector.multi_reduction <maximumf>, %54, %cst_34 [1] : vector<8x8xf32> to vector<8xf32>
    %56 = vector.shape_cast %55 : vector<8xf32> to vector<8x1xf32>
    %57 = vector.broadcast %56 : vector<8x1xf32> to vector<8x8xf32>
    %58 = arith.subf %54, %57 : vector<8x8xf32>
    %59 = math.exp %58 : vector<8x8xf32>
    %cst_35 = arith.constant 0.000000e+00 : f32
    %60 = vector.broadcast %cst_35 : f32 to vector<8x8xf32>
    %61 = arith.select %21, %60, %59 : vector<8x8xi1>, vector<8x8xf32>
    %cst_36 = arith.constant dense<0.000000e+00> : vector<8xf32>
    %62 = vector.multi_reduction <add>, %61, %cst_36 [1] : vector<8x8xf32> to vector<8xf32>
    %63 = vector.shape_cast %62 : vector<8xf32> to vector<8x1xf32>
    %64 = vector.broadcast %63 : vector<8x1xf32> to vector<8x8xf32>
    %65 = arith.divf %61, %64 : vector<8x8xf32>
    %cst_37 = arith.constant dense<0.000000e+00> : vector<8x16xf32>
    %66 = tpu.matmul %49, %24, %cst_37 {dimension_numbers = #tpu.dot_dimension_numbers<[1], [0], [0], [1], [0, 0, 1, 1], [], []>} : vector<8x8xf32>, vector<8x16xf32>, vector<8x16xf32> -> vector<8x16xf32>
    %c0_38 = arith.constant 0 : index
    %c0_39 = arith.constant 0 : index
    %67 = vector.load %arg24[%c0_38, %c0_39] : memref<8x32xf32, #tpu.memory_space<vmem>>, vector<8x16xf32>
    tpu.vector_store %arg24[%c0_38, %c0_39], %66 {strides = array<i32>} : memref<8x32xf32, #tpu.memory_space<vmem>>, vector<8x16xf32>,
    %68 = vector.shape_cast %65 : vector<8x8xf32> to vector<8x1x8xf32>
    "tpu.trace_start"() <{level = 10 : i32, message = "nrm,nmk->nrk"}> : () -> ()
    %cst_40 = arith.constant dense<0.000000e+00> : vector<8x1x32xf32>
    %69 = tpu.matmul %68, %5, %cst_40 {dimension_numbers = #tpu.dot_dimension_numbers<[2], [1], [1], [2], [0, 0, 0, 1, 1, 2], [0], [0]>} : vector<8x1x8xf32>, vector<8x8x32xf32>, vector<8x1x32xf32> -> vector<8x1x32xf32>
    "tpu.trace_stop"() : () -> ()
    %70 = vector.shape_cast %69 : vector<8x1x32xf32> to vector<8x32xf32>
    %c0_41 = arith.constant 0 : index
    %c0_42 = arith.constant 0 : index
    %71 = vector.load %arg11[%c0_41, %c0_42] : memref<32x32xf32, #tpu.memory_space<vmem>>, vector<32x16xf32>
    %cst_43 = arith.constant dense<0.000000e+00> : vector<8x16xf32>
    %72 = tpu.matmul %70, %71, %cst_43 {dimension_numbers = #tpu.dot_dimension_numbers<[1], [0], [0], [1], [0, 0, 1, 1], [], []>} : vector<8x32xf32>, vector<32x16xf32>, vector<8x16xf32> -> vector<8x16xf32>
    %c0_44 = arith.constant 0 : index
    %c0_45 = arith.constant 0 : index
    %73 = vector.load %arg25[%c0_44, %c0_45] : memref<8x32xf32, #tpu.memory_space<vmem>>, vector<8x16xf32>
    tpu.vector_store %arg25[%c0_44, %c0_45], %72 {strides = array<i32>} : memref<8x32xf32, #tpu.memory_space<vmem>>, vector<8x16xf32>,
    %74 = vector.extract_strided_slice %10 {offsets = [0, 16], sizes = [8, 16], strides = [1, 1]} : vector<8x32xf32> to vector<8x16xf32>
    %75 = vector.extract_strided_slice %15 {offsets = [0, 16], sizes = [8, 16], strides = [1, 1]} : vector<8x64xf32> to vector<8x16xf32>
    %76 = vector.extract_strided_slice %15 {offsets = [0, 48], sizes = [8, 16], strides = [1, 1]} : vector<8x64xf32> to vector<8x16xf32>
    "tpu.trace_start"() <{level = 10 : i32, message = "nc,mc->nm"}> : () -> ()
    %cst_46 = arith.constant dense<0.000000e+00> : vector<8x8xf32>
    %77 = tpu.matmul %74, %75, %cst_46 {dimension_numbers = #tpu.dot_dimension_numbers<[1], [1], [0], [0], [0, 0, 1, 0], [], []>} : vector<8x16xf32>, vector<8x16xf32>, vector<8x8xf32> -> vector<8x8xf32>
    "tpu.trace_stop"() : () -> ()
    %c16 = arith.constant 16 : index
    %c0_47 = arith.constant 0 : index
    %78 = vector.load %arg9[%c16, %c0_47] : memref<32x32xf32, #tpu.memory_space<vmem>>, vector<16x32xf32>
    %cst_48 = arith.constant dense<0.000000e+00> : vector<8x32xf32>
    %79 = tpu.matmul %74, %78, %cst_48 {dimension_numbers = #tpu.dot_dimension_numbers<[1], [0], [0], [1], [0, 0, 1, 1], [], []>} : vector<8x16xf32>, vector<16x32xf32>, vector<8x32xf32> -> vector<8x32xf32>
    %c0_49 = arith.constant 0 : index
    %c16_50 = arith.constant 16 : index
    %80 = vector.load %arg10[%c0_49, %c16_50] : memref<1x32xf32, #tpu.memory_space<vmem>>, vector<1x16xf32>
    %81 = vector.broadcast %80 : vector<1x16xf32> to vector<8x16xf32>
    %82 = arith.mulf %74, %81 : vector<8x16xf32>
    %cst_51 = arith.constant dense<0.000000e+00> : vector<8xf32>
    %83 = vector.multi_reduction <add>, %82, %cst_51 [1] : vector<8x16xf32> to vector<8xf32>
    %84 = vector.shape_cast %83 : vector<8xf32> to vector<8x1xf32>
    %85 = vector.shape_cast %79 : vector<8x32xf32> to vector<8x1x32xf32>
    "tpu.trace_start"() <{level = 10 : i32, message = "nrk,nmk->nrm"}> : () -> ()
    %cst_52 = arith.constant dense<0.000000e+00> : vector<8x1x8xf32>
    %86 = tpu.matmul %85, %5, %cst_52 {dimension_numbers = #tpu.dot_dimension_numbers<[2], [2], [1], [1], [0, 0, 0, 1, 1, 1], [0], [0]>} : vector<8x1x32xf32>, vector<8x8x32xf32>, vector<8x1x8xf32> -> vector<8x1x8xf32>
    "tpu.trace_stop"() : () -> ()
    %87 = vector.shape_cast %86 : vector<8x1x8xf32> to vector<8x8xf32>
    %88 = arith.addf %77, %87 : vector<8x8xf32>
    %89 = vector.broadcast %84 : vector<8x1xf32> to vector<8x8xf32>
    %90 = arith.addf %88, %89 : vector<8x8xf32>
    %cst_53 = arith.constant 2.500000e-01 : f32
    %91 = vector.broadcast %cst_53 : f32 to vector<8x8xf32>
    %92 = arith.mulf %90, %91 : vector<8x8xf32>
    %cst_54 = arith.constant dense<0xFF800000> : vector<8xf32>
    %93 = vector.multi_reduction <maximumf>, %92, %cst_54 [1] : vector<8x8xf32> to vector<8xf32>
    %94 = vector.shape_cast %93 : vector<8xf32> to vector<8x1xf32>
    %95 = vector.broadcast %94 : vector<8x1xf32> to vector<8x8xf32>
    %96 = arith.subf %92, %95 : vector<8x8xf32>
    %97 = math.exp %96 : vector<8x8xf32>
    %cst_55 = arith.constant dense<0.000000e+00> : vector<8xf32>
    %98 = vector.multi_reduction <add>, %97, %cst_55 [1] : vector<8x8xf32> to vector<8xf32>
    %99 = vector.shape_cast %98 : vector<8xf32> to vector<8x1xf32>
    %100 = vector.broadcast %99 : vector<8x1xf32> to vector<8x8xf32>
    %101 = arith.divf %97, %100 : vector<8x8xf32>
    %c0_56 = arith.constant 0 : index
    %c1 = arith.constant 1 : index
    %c0_57 = arith.constant 0 : index
    %c0_58 = arith.constant 0 : index
    %102 = vector.load %arg22[%c0_56, %c1, %c0_57, %c0_58] : memref<1x2x8x8xf32, #tpu.memory_space<vmem>>, vector<1x1x8x8xf32>
    %103 = vector.shape_cast %102 : vector<1x1x8x8xf32> to vector<8x8xf32>
    %104 = vector.shape_cast %101 : vector<8x8xf32> to vector<1x1x8x8xf32>
    tpu.vector_store %arg22[%c0_56, %c1, %c0_57, %c0_58], %104 {strides = array<i32>} : memref<1x2x8x8xf32, #tpu.memory_space<vmem>>, vector<1x1x8x8xf32>,
    %cst_59 = arith.constant -1.000000e+30 : f32
    %105 = vector.broadcast %cst_59 : f32 to vector<8x8xf32>
    %106 = arith.select %21, %105, %92 : vector<8x8xi1>, vector<8x8xf32>
    %cst_60 = arith.constant dense<0xFF800000> : vector<8xf32>
    %107 = vector.multi_reduction <maximumf>, %106, %cst_60 [1] : vector<8x8xf32> to vector<8xf32>
    %108 = vector.shape_cast %107 : vector<8xf32> to vector<8x1xf32>
    %109 = vector.broadcast %108 : vector<8x1xf32> to vector<8x8xf32>
    %110 = arith.subf %106, %109 : vector<8x8xf32>
    %111 = math.exp %110 : vector<8x8xf32>
    %cst_61 = arith.constant 0.000000e+00 : f32
    %112 = vector.broadcast %cst_61 : f32 to vector<8x8xf32>
    %113 = arith.select %21, %112, %111 : vector<8x8xi1>, vector<8x8xf32>
    %cst_62 = arith.constant dense<0.000000e+00> : vector<8xf32>
    %114 = vector.multi_reduction <add>, %113, %cst_62 [1] : vector<8x8xf32> to vector<8xf32>
    %115 = vector.shape_cast %114 : vector<8xf32> to vector<8x1xf32>
    %116 = vector.broadcast %115 : vector<8x1xf32> to vector<8x8xf32>
    %117 = arith.divf %113, %116 : vector<8x8xf32>
    %cst_63 = arith.constant dense<0.000000e+00> : vector<8x16xf32>
    %118 = tpu.matmul %101, %76, %cst_63 {dimension_numbers = #tpu.dot_dimension_numbers<[1], [0], [0], [1], [0, 0, 1, 1], [], []>} : vector<8x8xf32>, vector<8x16xf32>, vector<8x16xf32> -> vector<8x16xf32>
    %c0_64 = arith.constant 0 : index
    %c16_65 = arith.constant 16 : index
    %119 = vector.load %arg24[%c0_64, %c16_65] : memref<8x32xf32, #tpu.memory_space<vmem>>, vector<8x16xf32>
    tpu.vector_store %arg24[%c0_64, %c16_65], %118 {strides = array<i32>} : memref<8x32xf32, #tpu.memory_space<vmem>>, vector<8x16xf32>,
    %120 = vector.shape_cast %117 : vector<8x8xf32> to vector<8x1x8xf32>
    "tpu.trace_start"() <{level = 10 : i32, message = "nrm,nmk->nrk"}> : () -> ()
    %cst_66 = arith.constant dense<0.000000e+00> : vector<8x1x32xf32>
    %121 = tpu.matmul %120, %5, %cst_66 {dimension_numbers = #tpu.dot_dimension_numbers<[2], [1], [1], [2], [0, 0, 0, 1, 1, 2], [0], [0]>} : vector<8x1x8xf32>, vector<8x8x32xf32>, vector<8x1x32xf32> -> vector<8x1x32xf32>
    "tpu.trace_stop"() : () -> ()
    %122 = vector.shape_cast %121 : vector<8x1x32xf32> to vector<8x32xf32>
    %c0_67 = arith.constant 0 : index
    %c16_68 = arith.constant 16 : index
    %123 = vector.load %arg11[%c0_67, %c16_68] : memref<32x32xf32, #tpu.memory_space<vmem>>, vector<32x16xf32>
    %cst_69 = arith.constant dense<0.000000e+00> : vector<8x16xf32>
    %124 = tpu.matmul %122, %123, %cst_69 {dimension_numbers = #tpu.dot_dimension_numbers<[1], [0], [0], [1], [0, 0, 1, 1], [], []>} : vector<8x32xf32>, vector<32x16xf32>, vector<8x16xf32> -> vector<8x16xf32>
    %c0_70 = arith.constant 0 : index
    %c16_71 = arith.constant 16 : index
    %125 = vector.load %arg25[%c0_70, %c16_71] : memref<8x32xf32, #tpu.memory_space<vmem>>, vector<8x16xf32>
    tpu.vector_store %arg25[%c0_70, %c16_71], %124 {strides = array<i32>} : memref<8x32xf32, #tpu.memory_space<vmem>>, vector<8x16xf32>,
    %c0_72 = arith.constant 0 : index
    %c0_73 = arith.constant 0 : index
    %126 = vector.load %arg24[%c0_72, %c0_73] : memref<8x32xf32, #tpu.memory_space<vmem>>, vector<8x32xf32>
    %c0_74 = arith.constant 0 : index
    %c0_75 = arith.constant 0 : index
    %127 = vector.load %arg13[%c0_74, %c0_75] : memref<32x32xf32, #tpu.memory_space<vmem>>, vector<32x32xf32>
    %cst_76 = arith.constant dense<0.000000e+00> : vector<8x32xf32>
    %128 = tpu.matmul %126, %127, %cst_76 {dimension_numbers = #tpu.dot_dimension_numbers<[1], [0], [0], [1], [0, 0, 1, 1], [], []>} : vector<8x32xf32>, vector<32x32xf32>, vector<8x32xf32> -> vector<8x32xf32>
    %c0_77 = arith.constant 0 : index
    %c0_78 = arith.constant 0 : index
    %129 = vector.load %arg14[%c0_77, %c0_78] : memref<1x32xf32, #tpu.memory_space<vmem>>, vector<1x32xf32>
    %130 = vector.broadcast %129 : vector<1x32xf32> to vector<8x32xf32>
    %131 = arith.addf %128, %130 : vector<8x32xf32>
    %132 = arith.addf %131, %1 : vector<8x32xf32>
    %c0_79 = arith.constant 0 : index
    %c0_80 = arith.constant 0 : index
    %133 = vector.load %arg15[%c0_79, %c0_80] : memref<1x32xf32, #tpu.memory_space<vmem>>, vector<1x32xf32>
    %c0_81 = arith.constant 0 : index
    %c0_82 = arith.constant 0 : index
    %134 = vector.load %arg16[%c0_81, %c0_82] : memref<1x32xf32, #tpu.memory_space<vmem>>, vector<1x32xf32>
    %cst_83 = arith.constant dense<0.000000e+00> : vector<8xf32>
    %135 = vector.multi_reduction <add>, %132, %cst_83 [1] : vector<8x32xf32> to vector<8xf32>
    %136 = vector.shape_cast %135 : vector<8xf32> to vector<8x1xf32>
    %cst_84 = arith.constant 3.200000e+01 : f32
    %137 = vector.broadcast %cst_84 : f32 to vector<8x1xf32>
    %138 = arith.divf %136, %137 : vector<8x1xf32>
    %139 = vector.broadcast %138 : vector<8x1xf32> to vector<8x32xf32>
    %140 = arith.subf %132, %139 : vector<8x32xf32>
    %141 = arith.mulf %140, %140 : vector<8x32xf32>
    %cst_85 = arith.constant dense<0.000000e+00> : vector<8xf32>
    %142 = vector.multi_reduction <add>, %141, %cst_85 [1] : vector<8x32xf32> to vector<8xf32>
    %143 = vector.shape_cast %142 : vector<8xf32> to vector<8x1xf32>
    %cst_86 = arith.constant 3.200000e+01 : f32
    %144 = vector.broadcast %cst_86 : f32 to vector<8x1xf32>
    %145 = arith.divf %143, %144 : vector<8x1xf32>
    %cst_87 = arith.constant 9.99999974E-6 : f32
    %146 = vector.broadcast %cst_87 : f32 to vector<8x1xf32>
    %147 = arith.addf %145, %146 : vector<8x1xf32>
    %148 = math.rsqrt %147 : vector<8x1xf32>
    %149 = vector.broadcast %148 : vector<8x1xf32> to vector<8x32xf32>
    %150 = arith.mulf %140, %149 : vector<8x32xf32>
    %151 = vector.broadcast %133 : vector<1x32xf32> to vector<8x32xf32>
    %152 = arith.mulf %150, %151 : vector<8x32xf32>
    %153 = vector.broadcast %134 : vector<1x32xf32> to vector<8x32xf32>
    %154 = arith.addf %152, %153 : vector<8x32xf32>
    %c0_88 = arith.constant 0 : index
    %c0_89 = arith.constant 0 : index
    %c0_90 = arith.constant 0 : index
    %155 = vector.load %arg21[%c0_88, %c0_89, %c0_90] : memref<1x8x32xf32, #tpu.memory_space<vmem>>, vector<1x8x32xf32>
    %156 = vector.shape_cast %155 : vector<1x8x32xf32> to vector<8x32xf32>
    %157 = vector.shape_cast %154 : vector<8x32xf32> to vector<1x8x32xf32>
    tpu.vector_store %arg21[%c0_88, %c0_89, %c0_90], %157 {strides = array<i32>} : memref<1x8x32xf32, #tpu.memory_space<vmem>>, vector<1x8x32xf32>,
    %c0_91 = arith.constant 0 : index
    %c0_92 = arith.constant 0 : index
    %158 = vector.load %arg25[%c0_91, %c0_92] : memref<8x32xf32, #tpu.memory_space<vmem>>, vector<8x32xf32>
    %c0_93 = arith.constant 0 : index
    %c0_94 = arith.constant 0 : index
    %159 = vector.load %arg12[%c0_93, %c0_94] : memref<1x32xf32, #tpu.memory_space<vmem>>, vector<1x32xf32>
    %160 = vector.broadcast %159 : vector<1x32xf32> to vector<8x32xf32>
    %161 = arith.addf %158, %160 : vector<8x32xf32>
    %c0_95 = arith.constant 0 : index
    %c0_96 = arith.constant 0 : index
    %162 = vector.load %arg17[%c0_95, %c0_96] : memref<32x32xf32, #tpu.memory_space<vmem>>, vector<32x32xf32>
    %cst_97 = arith.constant dense<0.000000e+00> : vector<8x32xf32>
    %163 = tpu.matmul %161, %162, %cst_97 {dimension_numbers = #tpu.dot_dimension_numbers<[1], [0], [0], [1], [0, 0, 1, 1], [], []>} : vector<8x32xf32>, vector<32x32xf32>, vector<8x32xf32> -> vector<8x32xf32>
    %c0_98 = arith.constant 0 : index
    %c0_99 = arith.constant 0 : index
    %164 = vector.load %arg18[%c0_98, %c0_99] : memref<1x32xf32, #tpu.memory_space<vmem>>, vector<1x32xf32>
    %165 = vector.broadcast %164 : vector<1x32xf32> to vector<8x32xf32>
    %166 = arith.addf %163, %165 : vector<8x32xf32>
    %c0_100 = arith.constant 0 : index
    %c0_101 = arith.constant 0 : index
    %167 = vector.load %arg19[%c0_100, %c0_101] : memref<1x32xf32, #tpu.memory_space<vmem>>, vector<1x32xf32>
    %c0_102 = arith.constant 0 : index
    %c0_103 = arith.constant 0 : index
    %168 = vector.load %arg20[%c0_102, %c0_103] : memref<1x32xf32, #tpu.memory_space<vmem>>, vector<1x32xf32>
    %cst_104 = arith.constant dense<0.000000e+00> : vector<8xf32>
    %169 = vector.multi_reduction <add>, %166, %cst_104 [1] : vector<8x32xf32> to vector<8xf32>
    %170 = vector.shape_cast %169 : vector<8xf32> to vector<8x1xf32>
    %cst_105 = arith.constant 3.200000e+01 : f32
    %171 = vector.broadcast %cst_105 : f32 to vector<8x1xf32>
    %172 = arith.divf %170, %171 : vector<8x1xf32>
    %173 = vector.broadcast %172 : vector<8x1xf32> to vector<8x32xf32>
    %174 = arith.subf %166, %173 : vector<8x32xf32>
    %175 = arith.mulf %174, %174 : vector<8x32xf32>
    %cst_106 = arith.constant dense<0.000000e+00> : vector<8xf32>
    %176 = vector.multi_reduction <add>, %175, %cst_106 [1] : vector<8x32xf32> to vector<8xf32>
    %177 = vector.shape_cast %176 : vector<8xf32> to vector<8x1xf32>
    %cst_107 = arith.constant 3.200000e+01 : f32
    %178 = vector.broadcast %cst_107 : f32 to vector<8x1xf32>
    %179 = arith.divf %177, %178 : vector<8x1xf32>
    %cst_108 = arith.constant 9.99999974E-6 : f32
    %180 = vector.broadcast %cst_108 : f32 to vector<8x1xf32>
    %181 = arith.addf %179, %180 : vector<8x1xf32>
    %182 = math.rsqrt %181 : vector<8x1xf32>
    %183 = vector.broadcast %182 : vector<8x1xf32> to vector<8x32xf32>
    %184 = arith.mulf %174, %183 : vector<8x32xf32>
    %185 = vector.broadcast %167 : vector<1x32xf32> to vector<8x32xf32>
    %186 = arith.mulf %184, %185 : vector<8x32xf32>
    %187 = vector.broadcast %168 : vector<1x32xf32> to vector<8x32xf32>
    %188 = arith.addf %186, %187 : vector<8x32xf32>
    %c0_109 = arith.constant 0 : index
    %c0_110 = arith.constant 0 : index
    %c0_111 = arith.constant 0 : index
    %189 = vector.load %arg23[%c0_109, %c0_110, %c0_111] : memref<1x8x32xf32, #tpu.memory_space<vmem>>, vector<1x8x32xf32>
    %190 = vector.shape_cast %189 : vector<1x8x32xf32> to vector<8x32xf32>
    %191 = vector.shape_cast %188 : vector<8x32xf32> to vector<1x8x32xf32>
    tpu.vector_store %arg23[%c0_109, %c0_110, %c0_111], %191 {strides = array<i32>} : memref<1x8x32xf32, #tpu.memory_space<vmem>>, vector<1x8x32xf32>,
    return
  }
  func.func @transform_0(%arg0: i32, %arg1: i32) -> (i32, i32, i32) {
    %c0_i32 = arith.constant 0 : i32
    %c0_i32_0 = arith.constant 0 : i32
    return %arg0, %arg1, %c0_i32 : i32, i32, i32
  }
  func.func @transform_1(%arg0: i32, %arg1: i32) -> (i32, i32, i32) {
    %c0_i32 = arith.constant 0 : i32
    %c0_i32_0 = arith.constant 0 : i32
    %c0_i32_1 = arith.constant 0 : i32
    return %arg0, %c0_i32, %c0_i32_0 : i32, i32, i32
  }
  func.func @transform_2(%arg0: i32, %arg1: i32) -> (i32, i32, i32, i32) {
    %c0_i32 = arith.constant 0 : i32
    %c0_i32_0 = arith.constant 0 : i32
    %c0_i32_1 = arith.constant 0 : i32
    return %arg0, %arg1, %c0_i32, %c0_i32_0 : i32, i32, i32, i32
  }
  func.func @transform_3(%arg0: i32, %arg1: i32) -> (i32, i32) {
    %c0_i32 = arith.constant 0 : i32
    %c0_i32_0 = arith.constant 0 : i32
    %c0_i32_1 = arith.constant 0 : i32
    return %c0_i32, %c0_i32_0 : i32, i32
  }
  func.func @transform_4(%arg0: i32, %arg1: i32) -> (i32, i32) {
    %c0_i32 = arith.constant 0 : i32
    %c0_i32_0 = arith.constant 0 : i32
    %c0_i32_1 = arith.constant 0 : i32
    return %c0_i32, %c0_i32_0 : i32, i32
  }
  func.func @transform_5(%arg0: i32, %arg1: i32) -> (i32, i32) {
    %c0_i32 = arith.constant 0 : i32
    %c0_i32_0 = arith.constant 0 : i32
    %c0_i32_1 = arith.constant 0 : i32
    return %c0_i32, %c0_i32_0 : i32, i32
  }
  func.func @transform_6(%arg0: i32, %arg1: i32) -> (i32, i32) {
    %c0_i32 = arith.constant 0 : i32
    %c0_i32_0 = arith.constant 0 : i32
    %c0_i32_1 = arith.constant 0 : i32
    return %c0_i32, %c0_i32_0 : i32, i32
  }
  func.func @transform_7(%arg0: i32, %arg1: i32) -> (i32, i32) {
    %c0_i32 = arith.constant 0 : i32
    %c0_i32_0 = arith.constant 0 : i32
    %c0_i32_1 = arith.constant 0 : i32
    return %c0_i32, %c0_i32_0 : i32, i32
  }
  func.func @transform_8(%arg0: i32, %arg1: i32) -> (i32, i32) {
    %c0_i32 = arith.constant 0 : i32
    %c0_i32_0 = arith.constant 0 : i32
    %c0_i32_1 = arith.constant 0 : i32
    return %c0_i32, %c0_i32_0 : i32, i32
  }
  func.func @transform_9(%arg0: i32, %arg1: i32) -> (i32, i32) {
    %c0_i32 = arith.constant 0 : i32
    %c0_i32_0 = arith.constant 0 : i32
    %c0_i32_1 = arith.constant 0 : i32
    return %c0_i32, %c0_i32_0 : i32, i32
  }
  func.func @transform_10(%arg0: i32, %arg1: i32) -> (i32, i32) {
    %c0_i32 = arith.constant 0 : i32
    %c0_i32_0 = arith.constant 0 : i32
    %c0_i32_1 = arith.constant 0 : i32
    return %c0_i32, %c0_i32_0 : i32, i32
  }
  func.func @transform_11(%arg0: i32, %arg1: i32) -> (i32, i32) {
    %c0_i32 = arith.constant 0 : i32
    %c0_i32_0 = arith.constant 0 : i32
    %c0_i32_1 = arith.constant 0 : i32
    return %c0_i32, %c0_i32_0 : i32, i32
  }
  func.func @transform_12(%arg0: i32, %arg1: i32) -> (i32, i32) {
    %c0_i32 = arith.constant 0 : i32
    %c0_i32_0 = arith.constant 0 : i32
    %c0_i32_1 = arith.constant 0 : i32
    return %c0_i32, %c0_i32_0 : i32, i32
  }
  func.func @transform_13(%arg0: i32, %arg1: i32) -> (i32, i32) {
    %c0_i32 = arith.constant 0 : i32
    %c0_i32_0 = arith.constant 0 : i32
    %c0_i32_1 = arith.constant 0 : i32
    return %c0_i32, %c0_i32_0 : i32, i32
  }
  func.func @transform_14(%arg0: i32, %arg1: i32) -> (i32, i32) {
    %c0_i32 = arith.constant 0 : i32
    %c0_i32_0 = arith.constant 0 : i32
    %c0_i32_1 = arith.constant 0 : i32
    return %c0_i32, %c0_i32_0 : i32, i32
  }
  func.func @transform_15(%arg0: i32, %arg1: i32) -> (i32, i32) {
    %c0_i32 = arith.constant 0 : i32
    %c0_i32_0 = arith.constant 0 : i32
    %c0_i32_1 = arith.constant 0 : i32
    return %c0_i32, %c0_i32_0 : i32, i32
  }
  func.func @transform_16(%arg0: i32, %arg1: i32) -> (i32, i32) {
    %c0_i32 = arith.constant 0 : i32
    %c0_i32_0 = arith.constant 0 : i32
    %c0_i32_1 = arith.constant 0 : i32
    return %c0_i32, %c0_i32_0 : i32, i32
  }
  func.func @transform_17(%arg0: i32, %arg1: i32) -> (i32, i32) {
    %c0_i32 = arith.constant 0 : i32
    %c0_i32_0 = arith.constant 0 : i32
    %c0_i32_1 = arith.constant 0 : i32
    return %c0_i32, %c0_i32_0 : i32, i32
  }
  func.func @transform_18(%arg0: i32, %arg1: i32) -> (i32, i32) {
    %c0_i32 = arith.constant 0 : i32
    %c0_i32_0 = arith.constant 0 : i32
    %c0_i32_1 = arith.constant 0 : i32
    return %c0_i32, %c0_i32_0 : i32, i32
  }
  func.func @transform_19(%arg0: i32, %arg1: i32) -> (i32, i32, i32) {
    %c0_i32 = arith.constant 0 : i32
    %c0_i32_0 = arith.constant 0 : i32
    return %arg0, %arg1, %c0_i32 : i32, i32, i32
  }
  func.func @transform_20(%arg0: i32, %arg1: i32) -> (i32, i32, i32, i32) {
    %c0_i32 = arith.constant 0 : i32
    %c0_i32_0 = arith.constant 0 : i32
    %c0_i32_1 = arith.constant 0 : i32
    return %arg0, %c0_i32, %arg1, %c0_i32_0 : i32, i32, i32, i32
  }
  func.func @transform_21(%arg0: i32, %arg1: i32) -> (i32, i32, i32) {
    %c0_i32 = arith.constant 0 : i32
    %c0_i32_0 = arith.constant 0 : i32
    return %arg0, %arg1, %c0_i32 : i32, i32, i32
  }
}

</mosaic_0001>

<bundles_post_ra>
// kernel: tpu_custom_call.1
= control target key start
LH: loop header
LB: loop body
LE: loop exit
PB: predicated region body
PF: predicated region fallthrough
CT: control target
= control target key end

     0   :  { %s4076_s0 = inlined_call_operand.hbm [shape: f32[2,8,32], index: 0, kind: input, shape index: {}]   ;;  %s4077_s1 = inlined_call_operand.hbm [shape: f32[2,8,32], index: 1, kind: input, shape index: {}]   ;;  %s4078_s2 = inlined_call_operand.hbm [shape: f32[2,8,8,32], index: 2, kind: input, shape index: {}]   ;;  %s4079_s3 = inlined_call_operand.hbm [shape: f32[32,32], index: 3, kind: input, shape index: {}]   ;;  %s4080_s4 = inlined_call_operand.vmem [shape: f32[1,32], index: 4, kind: input, shape index: {}]   ;;  %s4081_s5 = inlined_call_operand.hbm [shape: f32[32,64], index: 5, kind: input, shape index: {}]   ;;  %s4082_s6 = inlined_call_operand.vmem [shape: f32[1,64], index: 6, kind: input, shape index: {}]   ;;  %s4083_s7 = inlined_call_operand.hbm [shape: f32[32,32], index: 7, kind: input, shape index: {}]   ;;  %s4084_s8 = inlined_call_operand.vmem [shape: f32[1,32], index: 8, kind: input, shape index: {}]   ;;  %s4085_s9 = inlined_call_operand.hbm [shape: f32[32,32], index: 9, kind: input, shape index: {}]   ;;  %s4086_s10 = inlined_call_operand.vmem [shape: f32[1,32], index: 10, kind: input, shape index: {}]   ;;  %s4087_s11 = inlined_call_operand.hbm [shape: f32[32,32], index: 11, kind: input, shape index: {}]   ;;  %s4088_s12 = inlined_call_operand.vmem [shape: f32[1,32], index: 12, kind: input, shape index: {}]   ;;  %s4089_s13 = inlined_call_operand.vmem [shape: f32[1,32], index: 13, kind: input, shape index: {}]   ;;  %s4090_s14 = inlined_call_operand.vmem [shape: f32[1,32], index: 14, kind: input, shape index: {}]   ;;  %s4091_s15 = inlined_call_operand.hbm [shape: f32[32,32], index: 15, kind: input, shape index: {}]   ;;  %s4092_s16 = inlined_call_operand.vmem [shape: f32[1,32], index: 16, kind: input, shape index: {}]   ;;  %s4093_s17 = inlined_call_operand.vmem [shape: f32[1,32], index: 17, kind: input, shape index: {}]   ;;  %s4094_s18 = inlined_call_operand.vmem [shape: f32[1,32], index: 18, kind: input, shape index: {}]   ;;  %s4095_s19 = inlined_call_operand.hbm [shape: f32[2,8,32], index: 19, kind: output, shape index: {0}]   ;;  %s4096_s20 = inlined_call_operand.hbm [shape: f32[2,2,8,8], index: 20, kind: output, shape index: {1}]   ;;  %s4097_s21 = inlined_call_operand.hbm [shape: f32[2,8,32], index: 21, kind: output, shape index: {2}]  }
   0x1   :  { %4119 = sst [smem:[#allocation38_spill]] %s4076_s0 }
   0x2   :  { %4120 = sst [smem:[#allocation39_spill]] %s4077_s1 }
   0x3   :  { %4121 = sst [smem:[#allocation40_spill]] %s4078_s2 }
   0x4   :  { %4122 = sst [smem:[#allocation41_spill]] %s4079_s3 }
   0x5   :  { %4123 = sst [smem:[#allocation42_spill]] %s4080_s4 }
   0x6   :  { %4124 = sst [smem:[#allocation43_spill]] %s4081_s5 }
   0x7   :  { %4125 = sst [smem:[#allocation44_spill]] %s4083_s7 }
   0x8   :  { %4126 = sst [smem:[#allocation45_spill]] %s4085_s9 }
   0x9   :  { %4127 = sst [smem:[#allocation46_spill]] %s4087_s11 }
   0xa   :  { %4128 = sst [smem:[#allocation47_spill]] %s4089_s13 }
   0xb   :  { %4129 = sst [smem:[#allocation48_spill]] %s4090_s14 }
   0xc   :  { %4130 = sst [smem:[#allocation49_spill]] %s4091_s15 }
   0xd   :  { %4131 = sst [smem:[#allocation50_spill]] %s4092_s16 }
   0xe   :  { %4132 = sst [smem:[#allocation51_spill]] %s4093_s17 }
   0xf   :  { %4133 = sst [smem:[#allocation52_spill]] %s4094_s18 }
  0x10   :  { %4134 = sst [smem:[#allocation53_spill]] %s4095_s19 }
  0x11   :  { %4135 = sst [smem:[#allocation54_spill]] %s4096_s20 }
  0x12   :  { %4136 = sst [smem:[#allocation55_spill]] %s4097_s21 }
  0x13   :  { %27 = vsyncpa [#allocation5], 0 }
  0x14   :  { %29 = vsyncpa [#allocation5 + $0x1], 0 }
  0x15   :  { %30 = vsyncpa [#allocation8], 0 }
  0x16   :  { %32 = vsyncpa [#allocation8 + $0x1], 0 }
  0x17   :  { %33 = vsyncpa [#allocation11], 0 }
  0x18   :  { %34 = vsyncpa [#allocation14], 0 }
  0x19   :  { %35 = vsyncpa [#allocation17], 0 }
  0x1a   :  { %36 = vsyncpa [#allocation6], 0 }
  0x1b   :  { %38 = vsyncpa [#allocation6 + $0x1], 0 }
  0x1c   :  { %39 = vsyncpa [#allocation21], 0 }
  0x1d   :  { %41 = vsyncpa [#allocation21 + $0x1], 0  ;;  %s3499_s2 = smov 0   ;;  %s3501_s25 = smov 0  }
  0x1e   :  { %s3503_s26 = smov 0   ;;  %s3505_s27 = smov 0  }
  0x1f   :  { %s3507_s3 = smov 0   ;;  %s3509_s28 = smov 0  }
  0x20 LB: > { %4137 = sst [smem:[#allocation30_spill]] %s3352_s2  ;;  %s3530_s29 = sadd.s32 4294967295, %s3372_s28   ;;  %s3372_s28 = sphi %s3509_s28, %s47_s28   ;;  %s3368_s3 = sphi %s3507_s3, %s4196_s3   ;;  %s3364_s27 = sphi %s3505_s27, %s4195_s27   ;;  %s3360_s26 = sphi %s3503_s26, %s4191_s26   ;;  %s3356_s25 = sphi %s3501_s25, %s4194_s25   ;;  %s3352_s2 = sphi %s3499_s2, %s4193_s2  }
  0x21   : > { %4138 = sst [smem:[#allocation31_spill]] %s3360_s26  ;;  %p2647_p0 = scmp.ge.s32.totalorder %s3372_s28, 1 }
  0x22   : > { %4139 = sst [smem:[#allocation32_spill]] %s3364_s27  ;;  %p82_p1 = scmp.eq.s32.totalorder %s3530_s29, 0 }
  0x23   : > { %4140 = sst [smem:[#allocation33_spill]] %s3372_s28  ;;  %p566_p2 = scmp.lt.s32.totalorder %s3372_s28, 3 }
  0x24   : > { %s4141_s30 = sld [smem:[#allocation41_spill]]  ;;  %s3374_s23 = smov [#allocation10]  }
  0x25   : > { %p3538_p3 = pnand %p2647_p0, %p566_p2  ;;  %s579_s1 = sshll.u32 %s3374_s23, 4  ;;  %s580_s1 = int_to_ptr.vmem [resolvable:$true] %s579_s1 }
  0x26   : > { %s4144_s7 = sld [smem:[#allocation44_spill]]  ;;  %s4099_s18 = smov 128  }
  0x27   : > { %p2785_p4 = pneg %p3538_p3  ;;  %s4101_s23 = smov 8  }
  0x28   : > { %s3377_s21 = smov [#allocation13]   ;;  %s4145_s11 = sld [smem:[#allocation46_spill]] }
  0x29   : > { %p3546_p5 = pnand %p2785_p4, %p82_p1  ;;  %s613_s17 = sshll.u32 %s3377_s21, 4  ;;  %s614_s17 = int_to_ptr.vmem [resolvable:$true] %s613_s17 }
  0x2a   : > { %s577_s5 = sshll.u32 %s4141_s30, 4  ;;  %s4103_s21 = sadd.s32 4294967294, %s3372_s28   ;;  %s578_s5 = int_to_ptr.hbm [resolvable:$true] %s577_s5 }
  0x2b   : > { %2788 = dma.hbm_to_vmem [thread:$0]  (!%p3546_p5), %s578_s5, 512, %s580_s1, [#allocation11], %s4099_s18, %s4099_s18, %s4101_s23  }
  0x2c   : > { %s611_s30 = sshll.u32 %s4144_s7, 4  ;;  %s3378_s5 = smov [#allocation16]   ;;  %s612_s30 = int_to_ptr.hbm [resolvable:$true] %s611_s30 }
  0x2d   : > { %2794 = dma.hbm_to_vmem [thread:$0]  (!%p3546_p5), %s612_s30, 512, %s614_s17, [#allocation14], %s4099_s18, %s4099_s18, %s4101_s23  }
  0x2e   : > { %s645_s7 = sshll.u32 %s4145_s11, 4  ;;  %s647_s1 = sshll.u32 %s3378_s5, 4  ;;  %s646_s7 = int_to_ptr.hbm [resolvable:$true] %s645_s7  ;;  %s648_s1 = int_to_ptr.vmem [resolvable:$true] %s647_s1 }
  0x2f   : > { %2800 = dma.hbm_to_vmem [thread:$0]  (!%p3546_p5), %s646_s7, 512, %s648_s1, [#allocation17], %s4099_s18, %s4099_s18, %s4101_s23  }
  0x30   : > { %s59_s0 = sadd.s32 1, %s3368_s3  ;;  %s68_s4 = sadd.s32 1, %s3360_s26 }
  0x31   : > { %p61_p7 = scmp.ge.s32.totalorder %s59_s0, 2  ;;  %p75_p8 = scmp.ne.s32.totalorder %s3360_s26, %s3356_s25 }
  0x32   : > { %p76_p9 = scmp.eq.s32.totalorder %s3372_s28, 0  ;;  %p81_p10 = scmp.ne.s32.totalorder %s3356_s25, %s3352_s2 }
  0x33   : > { %s4198_s0 = smov (%p61_p7, %s59_s0), 0  ;;  %p497_p13 = scmp.eq.s32.totalorder %s3530_s29, 1 }
  0x34   : > { %4146 = sst [smem:[#allocation34_spill]] %s4198_s0  ;;  %p3582_p11 = por %p76_p9, %p75_p8 }
  0x35   : > { %p3588_p12 = por %p82_p1, %p81_p10  ;;  %s63_s30 = ssub.s32 %s3368_s3, %s4198_s0 }
  0x36   : > { %p66_p0 = scmp.eq.s32.totalorder %s63_s30, 0  ;;  %p503_p2 = scmp.eq.s32.totalorder %s4103_s21, 1 }
  0x37   : > { %p3597_p4 = por %p497_p13, %p75_p8  ;;  %p2830_p7 = scmp.lt.s32.totalorder %s3372_s28, 2 }
  0x38   : > { %s3603_s1 = scalar_select %p66_p0, %s3360_s26, %s68_s4  }
  0x39   : > { %s4149_s5 = scalar_select %p3597_p4, 1, 0 }
  0x3a   : > { %4151 = sst [smem:[#allocation36_spill]] %s3603_s1  ;;  %p3605_p9 = por %p503_p2, %p81_p10 }
  0x3b   : > { %4150 = sst [smem:[#allocation35_spill]] %s4149_s5  ;;  %s3610_s23 = sand.u32 1, %s3360_s26  }
  0x3c   : > { %s4152_s18 = scalar_select %p3605_p9, 1, 0 }
  0x3d   : > { %s4115_s11 = sshll.u32 %s3610_s23, 3  ;;  %s2656_s30 = sshll.u32 %s3368_s3, 3 }
  0x3e   : > { %4153 = sst [smem:[#allocation37_spill]] %s4152_s18  ;;  %p3616_p6 = pnand %p2830_p7, %p3582_p11 }
  0x3f   : > { %s713_s0 = sand.u32 1, %s3372_s28   ;;  %s4155_s2 = sld [smem:[#allocation39_spill]] }
  0x40   : > { %s717_s26 = scalar_lea.vmem [#allocation7], %s4115_s11  ;;  %s3628_s5 = scalar_lea.sflag [#allocation8], %s713_s0 }
  0x41   : > { %s725_s20 = sshll.u32 %s717_s26, 4  ;;  %s2659_s17 = sshll.u32 %s3610_s23, 6  ;;  %s726_s20 = int_to_ptr.vmem [resolvable:$true] %s725_s20 }
  0x42   : > { %s4156_s27 = sld [smem:[#allocation43_spill]]  ;;  %s3379_s1 = smov [#allocation12]  }
  0x43   : > { %s596_s26 = sshll.u32 %s3379_s1, 4  ;;  %s4157_s9 = sld [smem:[#allocation45_spill]]  ;;  %s597_s26 = int_to_ptr.vmem [resolvable:$true] %s596_s26 }
  0x44   : > { %s3380_s14 = smov [#allocation15]   ;;  %s4160_s15 = sld [smem:[#allocation49_spill]] }
  0x45   : > { %s721_s19 = scalar_lea.hbm %s4155_s2, %s2656_s30  ;;  %s736_s2 = scalar_lea.vmem [#allocation9], %s2659_s17 }
  0x46   : > { %s723_s18 = sshll.u32 %s721_s19, 4  ;;  %s746_s19 = sshll.u32 %s736_s2, 4  ;;  %s724_s18 = int_to_ptr.hbm [resolvable:$true] %s723_s18  ;;  %s747_s19 = int_to_ptr.vmem [resolvable:$true] %s746_s19 }
  0x47   : > { %2810 = dma.hbm_to_vmem [thread:$0]  (!%p3616_p6), %s724_s18, 128, %s726_s20, %s3628_s5  }
  0x48   : > { %s594_s13 = sshll.u32 %s4156_s27, 4  ;;  %s4158_s18 = smov 8   ;;  %s595_s13 = int_to_ptr.hbm [resolvable:$true] %s594_s13 }
  0x49   : > { %s628_s11 = sshll.u32 %s4157_s9, 4  ;;  %s4159_s20 = smov 128   ;;  %s629_s11 = int_to_ptr.hbm [resolvable:$true] %s628_s11 }
  0x4a   : > { %2791 = dma.hbm_to_vmem [thread:$0]  (!%p3546_p5), %s595_s13, 512, %s597_s26, [#allocation11], %s4159_s20, %s4159_s20, %s4158_s18  }
  0x4b   : > { %s630_s27 = sshll.u32 %s3380_s14, 4  ;;  %s668_s2 = sshll.u32 %s4160_s15, 4  ;;  %s631_s27 = int_to_ptr.vmem [resolvable:$true] %s630_s27  ;;  %s669_s2 = int_to_ptr.hbm [resolvable:$true] %s668_s2 }
  0x4c   : > { %2797 = dma.hbm_to_vmem [thread:$0]  (!%p3546_p5), %s629_s11, 512, %s631_s27, [#allocation14], %s4159_s20, %s4159_s20, %s4158_s18  }
  0x4d   : > { %s3381_s1 = smov [#allocation18]   ;;  %s4161_s0 = sld [smem:[#allocation38_spill]] }
  0x4e   : > { %s670_s4 = sshll.u32 %s3381_s1, 4  ;;  %s4162_s17 = sshll.u32 %s3610_s23, 3  ;;  %s671_s4 = int_to_ptr.vmem [resolvable:$true] %s670_s4 }
  0x4f   : > { %2803 = dma.hbm_to_vmem [thread:$0]  (!%p3546_p5), %s669_s2, 512, %s671_s4, [#allocation17], %s4159_s20, %s4159_s20, %s4158_s18  }
  0x50   : > { %s697_s9 = scalar_lea.vmem [#allocation4], %s4162_s17  ;;  %s694_s11 = scalar_lea.sflag [#allocation5], %s3610_s23 }
  0x51   : > { %s706_s15 = sshll.u32 %s697_s9, 4  ;;  %s2747_s27 = sshll.u32 %s3368_s3, 6  ;;  %s707_s15 = int_to_ptr.vmem [resolvable:$true] %s706_s15 }
  0x52   : > { %s4163_s13 = sld [smem:[#allocation40_spill]]  ;;  %s3681_s9 = sand.u32 (!%p3538_p3), 1, %s3356_s25  }
  0x53   : > { %s702_s14 = scalar_lea.hbm %s4161_s0, %s2656_s30  ;;  %s761_s16 = scalar_lea.sflag (!%p3538_p3), [#allocation5], %s3681_s9 }
  0x54   : > { %s704_s28 = sshll.u32 %s702_s14, 4  ;;  %s705_s28 = int_to_ptr.hbm [resolvable:$true] %s704_s28 }
  0x55   : > { %2807 = dma.hbm_to_vmem [thread:$0]  (!%p3616_p6), %s705_s28, 128, %s707_s15, %s694_s11  }
  0x56   : > { %758 = sbr.rel (%p3538_p3) target bundleno = 2172 (0x87c), region = 96  ;;  %s3684_s15 = sshll.u32 (!%p3538_p3), %s3681_s9, 3 }
  0x57   : > { %s764_s23 = scalar_lea.vmem (!%p3538_p3), [#allocation4], %s3684_s15 }
  0x58   : > { %s743_s30 = scalar_lea.hbm %s4163_s13, %s2747_s27 }
  0x59   : > { %s744_s24 = sshll.u32 %s743_s30, 4  ;;  %s745_s24 = int_to_ptr.hbm [resolvable:$true] %s744_s24 }
  0x5a   : > { %2813 = dma.hbm_to_vmem [thread:$0]  (!%p3616_p6), %s745_s24, 1024, %s747_s19, %s3628_s5, %s4159_s20, %s4159_s20, %s4158_s18  }
  0x5b   : > { %3323 = dma.done.wait (%p3588_p12), %s761_s16, 128  }
  0x5c   : > { %3325 = vsyncadd (%p3588_p12), %s761_s16, 4294967168  ;;  %s770_s22 = sand.u32 1, %s3530_s29   ;;  %s774_s5 = scalar_lea.vmem [#allocation7], %s3684_s15 }
  0x5d   : > { %s771_s21 = scalar_lea.sflag [#allocation8], %s770_s22 }
  0x5e   : > { %3327 = dma.done.wait (%p3588_p12), %s771_s21, 1152  }
  0x5f   : > { %3329 = vsyncadd (%p3588_p12), %s771_s21, 4294966144  ;;  %s2665_s19 = sshll.u32 %s3681_s9, 6 }
  0x60   : > { %s3701_s18 = scalar_lea.vmem [#allocation9], %s2665_s19 }
  0x61   : > { %3331 = dma.done.wait (%p82_p1), [#allocation11], 1024  }
  0x62   : > { %3333 = vsyncadd (%p82_p1), [#allocation11], 4294966272 }
  0x63   : > { %3335 = dma.done.wait (%p82_p1), [#allocation14], 1024  }
  0x64   : > { %3337 = vsyncadd (%p82_p1), [#allocation14], 4294966272 }
  0x65   : > { %3339 = dma.done.wait (%p82_p1), [#allocation17], 1024  }
  0x66   : > { %3341 = vsyncadd (%p82_p1), [#allocation17], 4294966272  ;;  %v908_v0 = vld [vmem:[#allocation10 + $0x18] sm:$0xff]  ;;  %v907_v1 = vld [vmem:[#allocation10 + $0x10] sm:$0xff]  ;;  %vm913_vm0 = vcmask 261120   ;;  %s4164_s2 = sld [smem:[#allocation42_spill]]  ;;  %v969_v54 = vlaneseq }
  0x67   : > { %929 = vmatpush.msra.mxu0 %v908_v0  ;;  %v906_v2 = vld [vmem:[#allocation10 + $0x8] sm:$0xff]  ;;  %v905_v3 = vld [vmem:[#allocation10] sm:$0xff]  ;;  %v940_v7 = vld [vmem:[#allocation12 + $0x18] sm:$0xff]  ;;  %vm978_vm1 = vcmask 130048   ;;  %vm1227_vm2 = vcmask 1041409   ;;  %vm1230_vm3 = vcmask 1042434  }
  0x68   : > { %v3715_v4 = vld [vmem:[%s764_s23] sm:$0xff]  ;;  %v939_v8 = vld [vmem:[#allocation12 + $0x10] sm:$0xff]  ;;  %960 = vmatpush.msra.mxu1 %v940_v7  ;;  %v3743_v20 = vld [vmem:[%s3701_s18 + $0x18] sm:$0xff]  ;;  %vm1233_vm4 = vcmask 1043459   ;;  %vm1236_vm5 = vcmask 1044484   ;;  %vm1239_vm6 = vcmask 1045509  }
  0x69   : > { %930 = vmatpush.msra.mxu0 %v907_v1  ;;  %v977_v5 = vld [vmem:[#allocation13 + $0x8] sm:$0xff]  ;;  %v976_v6 = vld [vmem:[#allocation13] sm:$0xff]  ;;  %v896_v11 = vld [vmem:[%s774_s5] sm:$0xff]  ;;  %vm4118_vm7 = vcmask 1046534   ;;  %vm4117_vm8 = vcmask 1047559   ;;  %v3804_v61 = vshrl.u32 %v969_v54, 7 }
  0x6a   : > { %996 = vmatpush.msra.mxu2 %v977_v5  ;;  %v938_v9 = vld [vmem:[#allocation12 + $0x8] sm:$0xff]  ;;  %961 = vmatpush.msra.mxu1 %v939_v8  ;;  %v937_v10 = vld [vmem:[#allocation12] sm:$0xff]  ;;  %v2912_v13 = vld [vmem:[%s4084_s8] ss:$0 sm:$0xff]  ;;  %v3806_v62 = vand.u32 127, %v969_v54  ;;  %vm1273_vm9 = vcmask 64512  }
  0x6b   : > { %931 = vmatpush.msra.mxu0 %v906_v2  ;;  %v3735_v18 = vld [vmem:[%s3701_s18] sm:$0xff]  ;;  %v3740_v19 = vld [vmem:[%s3701_s18 + $0x8] sm:$0xff]  ;;  %v3755_v22 = vld [vmem:[%s3701_s18 + $0x10] sm:$0xff]  ;;  %s3382_s28 = smov 112   ;;  %s3383_s17 = smov 96  }
  0x6c   : > { %997 = vmatpush.msra.mxu2 %v976_v6  ;;  %962 = vmatpush.msra.mxu1 %v938_v9  ;;  %v2911_v12 = vld [vmem:[%s4164_s2] ss:$0 sm:$0xff]  ;;  %v3746_v21 = vld [vmem:[%s3701_s18 + $0x20] sm:$0xff]  ;;  %v3763_v24 = vld [vmem:[%s3701_s18 + $0x28] sm:$0xff]  ;;  %vm4116_vm10 = vcmp.eq.s32.totalorder %v3804_v61, %v3806_v62  ;;  %s2673_s1 = sshll.u32 %s3681_s9, 4  ;;  %s3384_s30 = smov 80  }
  0x6d   : > { %932 = vmatpush.msra.mxu0 %v905_v3  ;;  %2678 = vmatpush.xpose.msk.msra.mxu3 %vm913_vm0, %v3735_v18  ;;  %v2913_v23 = vld [vmem:[%s4082_s6] ss:$0 sm:$0xff]  ;;  %v3766_v25 = vld [vmem:[%s3701_s18 + $0x38] sm:$0xff]  ;;  %s3834_s13 = scalar_lea.vmem [#allocation20], %s2673_s1  ;;  %s3385_s24 = smov 16  }
  0x6e   : > { %2675 = vmatmul.msk.f32.vlgmr.msra.gmra.mxu0 %vm913_vm0, %v3715_v4  ;;  %963 = vmatpush.msra.mxu1 %v937_v10  ;;  %v3777_v28 = vld [vmem:[%s3701_s18 + $0x30] sm:$0xff]  ;;  %s4173_s7 = sld [smem:[#allocation50_spill]]  ;;  %s2375_s23 = sshll.u32 %s3834_s13, 4  ;;  %s2376_s23 = int_to_ptr.vmem [resolvable:$true] %s2375_s23 }
  0x6f   : > { %2676 = vmatmul.msk.f32.vlgmr.msra.gmra.mxu1 %vm913_vm0, %v896_v11  ;;  %2680 = vmatpush.xpose.msk.msrb.mxu2 %vm913_vm0, %v3740_v19  ;;  %s4174_s4 = sld [smem:[#allocation47_spill]]  ;;  %s3993_s5 = scalar_lea.sflag [#allocation21], %s770_s22 }
  0x70   : > { %2684 = vmatpush.xpose.msk.msrb.mxu0 %vm913_vm0, %v3743_v20  ;;  %2686 = vmatpush.xpose.msk.msrb.mxu1 %vm913_vm0, %v3746_v21  ;;  %s4175_s26 = sld [smem:[#allocation32_spill]] }
  0x71   : > { %2682 = vmatpush.xpose.msk.msrb.mxu3 %vm913_vm0, %v3755_v22 }
  0x74   : > { %2692 = vmatpush.xpose.msk.msra.mxu0 %vm913_vm0, %v3766_v25 }
  0x76   : > { %s2748_s27 = sshll.u32 %s4175_s26, 4 }
  0xeb   : > { %v934_v14 = vpop.f32.mrf.mxu0 }
  0xec   : > { %v3728_v15 = vadd.f32 %v2911_v12, %v934_v14  ;;  %v965_v26 = vpop.f32.mrf.mxu1 }
  0xed   : > { %v3772_v27 = vadd.f32 %v2913_v23, %v965_v26  ;;  %v2914_v26 = vld [vmem:[%s4084_s8] ss:$0 sm:$0xff] }
  0xee   : > { %2677 = vmatmul.msk.f32.vlgmr.msra.gmra.mxu2 %vm978_vm1, %v3728_v15  ;;  %v1006_v16 = vmul.f32 %v2912_v13, %v3728_v15 }
  0xef   : > { %2688 = vmatpush.xpose.msk.msra.mxu2 %vm913_vm0, %v3763_v24  ;;  %2694 = vmatpush.xpose.msk.msra.mxu1 %vm978_vm1, %v3772_v27 }
  0xf0   : > { %v1007_v17 = vsel %vm978_vm1, %v1006_v16, 0.0 }
  0xf1   : > { %1008 = vadd.xlane.f32.xlu0 %v1007_v17 }
 0x164   : > { %v1009_v0 = vpop.xlane.xlu0 %1008 }
 0x171   : > { %v999_v29 = vpop.f32.mrf.mxu2 }
 0x172   : > { %2679 = vmatmul.msk.f32.vlgmr.msra.gmra.mxu3 %vm913_vm0, %v999_v29  ;;  %v1011_v30 = vrot.slane %v999_v29, 1  ;;  %v1013_v31 = vrot.slane %v999_v29, 3  ;;  %v1014_v32 = vrot.slane %v999_v29, 4  ;;  %v1012_v33 = vrot.slane %v999_v29, 2 }
 0x173   : > { %2690 = vmatpush.xpose.msk.msra.mxu3 %vm913_vm0, %v3777_v28  ;;  %v1015_v34 = vrot.slane %v999_v29, 5  ;;  %v1017_v35 = vrot.slane %v999_v29, 7  ;;  %v1016_v36 = vrot.slane %v999_v29, 6  ;;  %v1615_v29 = vmul.f32 %v2914_v26, %v3728_v15 }
 0x174   : > { %2681 = vmatmul.msk.f32.vlgmr.msrb.gmra.mxu2 %vm913_vm0, %v1011_v30  ;;  %2685 = vmatmul.msk.f32.vlgmr.msrb.gmra.mxu0 %vm913_vm0, %v1013_v31 }
 0x175   : > { %2687 = vmatmul.msk.f32.vlgmr.msrb.gmra.mxu1 %vm913_vm0, %v1014_v32  ;;  %1399 = vmatpush.msrb.mxu0 %v3740_v19 }
 0x176   : > { %1421 = vmatpush.msrb.mxu1 %v3755_v22 }
 0x17a   : > { %2683 = vmatmul.msk.f32.vlgmr.msrb.gmra.mxu3 %vm913_vm0, %v1012_v33 }
 0x17b   : > { %1377 = vmatpush.msrb.mxu3 %v3735_v18 }
 0x17c   : > { %2689 = vmatmul.msk.f32.vlgmr.msra.gmra.mxu2 %vm913_vm0, %v1015_v34  ;;  %2693 = vmatmul.msk.f32.vlgmr.msra.gmra.mxu0 %vm913_vm0, %v1017_v35 }
 0x17d   : > { %2695 = vmatmul.msk.f32.vlgmr.msra.gmra.mxu1 %vm978_vm1, %v3728_v15  ;;  %1487 = vmatpush.msra.mxu0 %v3763_v24 }
 0x17e   : > { %1509 = vmatpush.msra.mxu1 %v3777_v28 }
 0x182   : > { %2691 = vmatmul.msk.f32.vlgmr.msra.gmra.mxu3 %vm913_vm0, %v1016_v36 }
 0x183   : > { %1465 = vmatpush.msra.mxu3 %v3746_v21 }
 0x1f1   : > { %v1115_v39 = vpop.f32.mrf.mxu0 }
 0x1f2   : > { %v1232_v43 = vrot.slane %v1115_v39, 5  ;;  %v1140_v44 = vpop.f32.mrf.mxu1 }
 0x1f3   : > { %v1235_v49 = vrot.slane %v1140_v44, 4 }
 0x1f5   : > { %v1040_v37 = vpop.f32.mrf.mxu3 }
 0x1f7   : > { %v1065_v38 = vpop.f32.mrf.mxu2 }
 0x1f8   : > { %v1226_v40 = vrot.slane %v1065_v38, 7 }
 0x1f9   : > { %v1215_v51 = vpop.f32.mrf.mxu0 }
 0x1fa   : > { %v1228_v45 = vsel %vm1227_vm2, %v1226_v40, %v1040_v37  ;;  %v1244_v56 = vrot.slane %v1215_v51, 1  ;;  %v1268_v59 = vpop.f32.mrf.mxu1 }
 0x1fd   : > { %v1090_v41 = vpop.f32.mrf.mxu3 }
 0x1fe   : > { %v1229_v42 = vrot.slane %v1090_v41, 6 }
 0x1ff   : > { %v1165_v47 = vpop.f32.mrf.mxu2 }
 0x200   : > { %v1231_v46 = vsel %vm1230_vm3, %v1229_v42, %v1228_v45  ;;  %v1238_v50 = vrot.slane %v1165_v47, 3 }
 0x201   : > { %v1234_v48 = vsel %vm1233_vm4, %v1232_v43, %v1231_v46 }
 0x202   : > { %v1237_v52 = vsel %vm1236_vm5, %v1235_v49, %v1234_v48 }
 0x203   : > { %v1240_v57 = vsel %vm1239_vm6, %v1238_v50, %v1237_v52 }
 0x205   : > { %v1190_v53 = vpop.f32.mrf.mxu3 }
 0x206   : > { %v1241_v55 = vrot.slane %v1190_v53, 2 }
 0x208   : > { %v1243_v58 = vsel %vm4118_vm7, %v1241_v55, %v1240_v57 }
 0x209   : > { %v1246_v60 = vsel %vm4117_vm8, %v1244_v56, %v1243_v58  ;;  %v1586_v58 = vld [vmem:[#allocation13 + $0x18] sm:$0xff] }
 0x20a   : > { %v1269_v63 = vadd.f32 %v1268_v59, %v1246_v60  ;;  %v1585_v59 = vld [vmem:[#allocation13 + $0x10] sm:$0xff] }
 0x20c   : > { %v1271_v1 = vadd.f32 %v1269_v63, %v1009_v0 }
 0x20e   : > { %v1272_v2 = vmul.f32 0.25, %v1271_v1 }
 0x210   : > { %v1274_v3 = vsel %vm1273_vm9, %v1272_v2, -inf  ;;  %v1299_v5 = vsel %vm4116_vm10, -1e+30, %v1272_v2 }
 0x211   : > { %1275 = vmax.xlane.f32.xlu0 %v1274_v3  ;;  %v1300_v6 = vsel %vm1273_vm9, %v1299_v5, -inf }
 0x212   : > { %1301 = vmax.xlane.f32.xlu1 %v1300_v6  ;;  %v3863_v6 = vld [vmem:[#allocation15 + $0x10] sm:$0xff] }
 0x225   : > { %1587 = vrot.lane.b32.xlu0 %v3728_v15, %s3382_s28 }
 0x284   : > { %v1276_v7 = vpop.xlane.xlu0 %1275 }
 0x285   : > { %v1277_v8 = vsub.f32 %v1272_v2, %v1276_v7  ;;  %v1302_v9 = vpop.xlane.xlu1 %1301  ;;  %v3866_v7 = vld [vmem:[#allocation15 + $0x8] sm:$0xff] }
 0x286   : > { %v1303_v10 = vsub.f32 %v1299_v5, %v1302_v9  ;;  %v3860_v5 = vld [vmem:[#allocation15 + $0x18] sm:$0xff] }
 0x287   : > { %v1278_v11 = vmul.f32 1.442695, %v1277_v8  ;;  %v3869_v8 = vld [vmem:[#allocation15] sm:$0xff] }
 0x288   : > { %v1304_v12 = vmul.f32 1.442695, %v1303_v10 }
 0x289   : > { %2922 = vpow2.f32 %v1278_v11 }
 0x28a   : > { %2924 = vpow2.f32 %v1304_v12 }
 0x28f   : > { %v2923_v13 = vpop.eup %2922 }
 0x290   : > { %v2925_v14 = vpop.eup %2924  ;;  %v1280_v16 = vsel %vm1273_vm9, %v2923_v13, 0.0 }
 0x291   : > { %1281 = vadd.xlane.f32.xlu1 %v1280_v16  ;;  %v1306_v17 = vsel %vm4116_vm10, 0.0, %v2925_v14 }
 0x292   : > { %v1307_v23 = vsel %vm1273_vm9, %v1306_v17, 0.0 }
 0x293   : > { %1308 = vadd.xlane.f32.xlu2 %v1307_v23 }
 0x297   : > { %v1588_v3 = vpop.permute.xlu0 %1587 }
 0x2aa   : > { %1807 = vrot.lane.b32.xlu1 %v3772_v27, %s3382_s28 }
 0x2ab   : > { %1325 = vrot.lane.b32.xlu2 %v3772_v27, %s3383_s17  ;;  %s879_s17 = scalar_lea.vmem [#allocation19], %s3684_s15 }
 0x2b3   : > { %1617 = vrot.lane.b32.xlu2 %v1615_v29, %s3382_s28 }
 0x304   : > { %v1282_v30 = vpop.xlane.xlu1 %1281 }
 0x305   : > { %2926 = vrcp.f32 %v1282_v30  ;;  %v1294_v38 = vand.u32 2147483648, %v1282_v30  ;;  %v1292_v40 = vand.u32 2147483647, %v1282_v30  ;;  %vm1288_vm12 = vweird.f32 %v1282_v30 }
 0x306   : > { %v1309_v31 = vpop.xlane.xlu2 %1308 }
 0x307   : > { %2928 = vrcp.f32 %v1309_v31  ;;  %v1321_v15 = vand.u32 2147483648, %v1309_v31  ;;  %v1319_v44 = vand.u32 2147483647, %v1309_v31  ;;  %v1295_v45 = vor.u32 1.1754944e-38, %v1294_v38 }
 0x308   : > { %vm1293_vm15 = vcmp.eq.f32.partialorder %v1292_v40, 8.507059e+37  ;;  %vm1315_vm10 = vweird.f32 %v1309_v31 }
 0x309   : > { %v1322_v49 = vor.u32 1.1754944e-38, %v1321_v15  ;;  %vm1320_vm7 = vcmp.eq.f32.partialorder %v1319_v44, 8.507059e+37 }
 0x30b   : > { %v2927_v32 = vpop.eup %2926 }
 0x30c   : > { %v1284_v33 = vmul.f32 %v2927_v32, %v1282_v30  ;;  %vm1289_vm11 = vweird.f32 %v2927_v32 }
 0x30d   : > { %v2929_v34 = vpop.eup %2928  ;;  %vm1290_vm14 = vmor %vm1288_vm12, %vm1289_vm11  ;;  %vm4169_vm11 = vcmp.eq.s32.totalorder %v3804_v61, %v3806_v62 }
 0x30e   : > { %v1285_v35 = vsub.f32 1.0, %v1284_v33  ;;  %v1311_v36 = vmul.f32 %v2929_v34, %v1309_v31  ;;  %v1326_v37 = vpop.permute.xlu2 %1325  ;;  %vm1316_vm13 = vweird.f32 %v2929_v34  ;;  %vm4170_vm12 = vmmov %vm4169_vm11 }
 0x30f   : > { %1346 = vmatpush.msrb.mxu2 %v1326_v37  ;;  %vm1317_vm8 = vmor %vm1315_vm10, %vm1316_vm13 }
 0x310   : > { %v1286_v39 = vmul.f32 %v2927_v32, %v1285_v35  ;;  %v1312_v41 = vsub.f32 1.0, %v1311_v36 }
 0x311   : > { %1443 = vmatpush.msra.mxu2 %v3743_v20 }
 0x312   : > { %v1287_v42 = vadd.f32 %v2927_v32, %v1286_v39  ;;  %v1313_v43 = vmul.f32 %v2929_v34, %v1312_v41 }
 0x314   : > { %v1291_v46 = vsel %vm1290_vm14, %v2927_v32, %v1287_v42  ;;  %v1314_v47 = vadd.f32 %v2929_v34, %v1313_v43 }
 0x315   : > { %v1296_v48 = vsel %vm1293_vm15, %v1295_v45, %v1291_v46 }
 0x316   : > { %v1318_v50 = vsel %vm1317_vm8, %v2929_v34, %v1314_v47  ;;  %v1618_v51 = vpop.permute.xlu2 %1617  ;;  %v1297_v52 = vmul.f32 %v2923_v13, %v1296_v48  ;;  %vm4166_vm8 = vcmask 1047559  }
 0x317   : > { %v1323_v53 = vsel %vm1320_vm7, %v1322_v49, %v1318_v50  ;;  %v1620_v54 = vsel %vm978_vm1, %v1618_v51, 0.0  ;;  %vm4165_vm7 = vcmask 1046534   ;;  %vm4168_vm10 = vmmov %vm4166_vm8 }
 0x318   : > { %v1324_v55 = vmul.f32 %v1323_v53, %v1306_v17  ;;  %1621 = vadd.xlane.f32.xlu0 %v1620_v54  ;;  %2696 = vmatmul.msk.f32.vlgmr.msrb.gmra.mxu2 %vm1273_vm9, %v1297_v52  ;;  %1298 = vst.msk [vmem:[%s3834_s13] sm:$0xff] %vm1273_vm9, %v1297_v52 }
 0x319   : > { %1531 = vmatpush.msrb.mxu2 %v3766_v25 }
 0x31a   : > { %2697 = vmatmul.msk.f32.vlgmr.msrb.gmra.mxu3 %vm1273_vm9, %v1324_v55  ;;  %v1353_v56 = vrot.slane %v1324_v55, 1  ;;  %v1354_v57 = vrot.slane %v1324_v55, 2  ;;  %v1355_v60 = vrot.slane %v1324_v55, 3  ;;  %v1356_v63 = vrot.slane %v1324_v55, 4 }
 0x31b   : > { %v1357_v0 = vrot.slane %v1324_v55, 5  ;;  %v1358_v1 = vrot.slane %v1324_v55, 6  ;;  %v1359_v2 = vrot.slane %v1324_v55, 7  ;;  %1576 = vmatpush.msrb.mxu3 %v3860_v5 }
 0x31c   : > { %2698 = vmatmul.msk.f32.vlgmr.msrb.gmra.mxu0 %vm1273_vm9, %v1353_v56  ;;  %2699 = vmatmul.msk.f32.vlgmr.msrb.gmra.mxu1 %vm1273_vm9, %v1354_v57  ;;  %v1808_v37 = vpop.permute.xlu1 %1807 }
 0x31d   : > { %1605 = vmatpush.msrb.mxu0 %v1586_v58  ;;  %2707 = vmatpush.xpose.msk.msrb.mxu1 %vm913_vm0, %v3735_v18 }
 0x31e   : > { %1577 = vmatpush.msrb.mxu3 %v3863_v6 }
 0x31f   : > { %1606 = vmatpush.msrb.mxu0 %v1585_v59 }
 0x320   : > { %2700 = vmatmul.msk.f32.vlgmr.msra.gmra.mxu2 %vm1273_vm9, %v1355_v60  ;;  %1578 = vmatpush.msrb.mxu3 %v3866_v7 }
 0x321   : > { %2709 = vmatpush.xpose.msk.msra.mxu2 %vm913_vm0, %v3740_v19 }
 0x322   : > { %2701 = vmatmul.msk.f32.vlgmr.msra.gmra.mxu3 %vm1273_vm9, %v1356_v63 }
 0x323   : > { %1579 = vmatpush.msrb.mxu3 %v3869_v8 }
 0x324   : > { %2702 = vmatmul.msk.f32.vlgmr.msra.gmra.mxu0 %vm1273_vm9, %v1357_v0  ;;  %2703 = vmatmul.msk.f32.vlgmr.msra.gmra.mxu1 %vm1273_vm9, %v1358_v1 }
 0x325   : > { %2713 = vmatpush.xpose.msk.msra.mxu0 %vm913_vm0, %v3743_v20  ;;  %2715 = vmatpush.xpose.msk.msra.mxu1 %vm913_vm0, %v3746_v21 }
 0x326   : > { %2711 = vmatpush.xpose.msk.msra.mxu3 %vm913_vm0, %v3755_v22 }
 0x328   : > { %2704 = vmatmul.msk.f32.vlgmr.msrb.gmra.mxu2 %vm1273_vm9, %v1359_v2 }
 0x329   : > { %2717 = vmatpush.xpose.msk.msrb.mxu2 %vm913_vm0, %v3763_v24 }
 0x32c   : > { %2706 = vmatmul.msk.f32.vlgmr.msrb.gmra.mxu0 %vm978_vm1, %v1588_v3 }
 0x32d   : > { %2721 = vmatpush.xpose.msk.msrb.mxu0 %vm913_vm0, %v3766_v25 }
 0x399   : > { %v1401_v9 = vpop.f32.mrf.mxu0  ;;  %v1423_v12 = vpop.f32.mrf.mxu1 }
 0x39a   : > { %v1548_v13 = vrot.slane %v1401_v9, 7  ;;  %v1550_v17 = vrot.slane %v1423_v12, 6  ;;  %v1622_v12 = vpop.xlane.xlu0 %1621 }
 0x39b   : > { %v1348_v10 = vpop.f32.mrf.mxu2 }
 0x39c   : > { %1351 = vst.msk [vmem:[#allocation2] sm:$0xff] %vm978_vm1, %v1348_v10 }
 0x39d   : > { %v1379_v11 = vpop.f32.mrf.mxu3 }
 0x39e   : > { %v1549_v16 = vsel %vm1227_vm2, %v1548_v13, %v1379_v11 }
 0x39f   : > { %v1551_v29 = vsel %vm1230_vm3, %v1550_v17, %v1549_v16 }
 0x3a1   : > { %v1489_v14 = vpop.f32.mrf.mxu0  ;;  %v1511_v34 = vpop.f32.mrf.mxu1 }
 0x3a2   : > { %v1556_v33 = vrot.slane %v1489_v14, 3  ;;  %v1558_v41 = vrot.slane %v1511_v34, 2 }
 0x3a3   : > { %v1445_v23 = vpop.f32.mrf.mxu2 }
 0x3a4   : > { %v1552_v26 = vrot.slane %v1445_v23, 5 }
 0x3a5   : > { %v1467_v30 = vpop.f32.mrf.mxu3 }
 0x3a6   : > { %v1553_v31 = vsel %vm1233_vm4, %v1552_v26, %v1551_v29  ;;  %v1554_v32 = vrot.slane %v1467_v30, 4 }
 0x3a8   : > { %v1555_v35 = vsel %vm1236_vm5, %v1554_v32, %v1553_v31 }
 0x3a9   : > { %v1608_v36 = vpop.f32.mrf.mxu0  ;;  %v1557_v38 = vsel %vm1239_vm6, %v1556_v33, %v1555_v35 }
 0x3aa   : > { %2708 = vmatmul.msk.f32.vlgmr.msrb.gmra.mxu1 %vm913_vm0, %v1608_v36  ;;  %v1624_v39 = vrot.slane %v1608_v36, 1  ;;  %v1626_v40 = vrot.slane %v1608_v36, 3  ;;  %v1559_v43 = vsel %vm4165_vm7, %v1558_v41, %v1557_v38  ;;  %v1627_v45 = vrot.slane %v1608_v36, 4 }
 0x3ab   : > { %2723 = vmatpush.xpose.msk.msrb.mxu1 %vm978_vm1, %v1808_v37  ;;  %v1533_v15 = vpop.f32.mrf.mxu2  ;;  %v1628_v46 = vrot.slane %v1608_v36, 5  ;;  %v1630_v47 = vrot.slane %v1608_v36, 7  ;;  %v1625_v48 = vrot.slane %v1608_v36, 2  ;;  %v2901_v41 = vpack.i.bf16 %v3863_v6, %v3860_v5 }
 0x3ac   : > { %v1560_v42 = vrot.slane %v1533_v15, 1  ;;  %2710 = vmatmul.msk.f32.vlgmr.msra.gmra.mxu2 %vm913_vm0, %v1624_v39  ;;  %2714 = vmatmul.msk.f32.vlgmr.msra.gmra.mxu0 %vm913_vm0, %v1626_v40  ;;  %v2906_v15 = vpack.i.bf16 %v3869_v8, %v3866_v7 }
 0x3ad   : > { %1987 = vmatpush.msra.mxu0 %v3740_v19  ;;  %v1629_v19 = vrot.slane %v1608_v36, 6 }
 0x3ae   : > { %v1561_v44 = vsel %vm4166_vm8, %v1560_v42, %v1559_v43 }
 0x3af   : > { %2705 = vmatmul.msk.f32.vlgmr.msrb.gmra.mxu3 %vm913_vm0, %v1561_v44 }
 0x3b0   : > { %2719 = vmatpush.xpose.msk.msrb.mxu3 %vm913_vm0, %v3777_v28 }
 0x3b2   : > { %2716 = vmatmul.msk.f32.vlgmr.msra.gmra.mxu1 %vm913_vm0, %v1627_v45 }
 0x3b3   : > { %2009 = vmatpush.msra.mxu1 %v3755_v22 }
 0x3b4   : > { %2718 = vmatmul.msk.f32.vlgmr.msrb.gmra.mxu2 %vm913_vm0, %v1628_v46  ;;  %2722 = vmatmul.msk.f32.vlgmr.msrb.gmra.mxu0 %vm913_vm0, %v1630_v47 }
 0x3b5   : > { %2075 = vmatpush.msrb.mxu0 %v3763_v24 }
 0x3b7   : > { %2712 = vmatmul.msk.f32.vlgmr.msra.gmra.mxu3 %vm913_vm0, %v1625_v48 }
 0x3b8   : > { %1965 = vmatpush.msra.mxu3 %v3735_v18 }
 0x3ba   : > { %2724 = vmatmul.msk.f32.vlgmr.msrb.gmra.mxu1 %vm978_vm1, %v1588_v3 }
 0x3bb   : > { %2097 = vmatpush.msrb.mxu1 %v3777_v28 }
 0x3bf   : > { %2720 = vmatmul.msk.f32.vlgmr.msrb.gmra.mxu3 %vm913_vm0, %v1629_v19 }
 0x3c0   : > { %2053 = vmatpush.msrb.mxu3 %v3746_v21 }
 0x427   : > { %v1650_v22 = vpop.f32.mrf.mxu1 }
 0x429   : > { %v1716_v51 = vpop.f32.mrf.mxu0 }
 0x42a   : > { %v1821_v54 = vrot.slane %v1716_v51, 5 }
 0x42f   : > { %v1672_v50 = vpop.f32.mrf.mxu2  ;;  %v1738_v55 = vpop.f32.mrf.mxu1 }
 0x430   : > { %v1817_v24 = vrot.slane %v1672_v50, 7  ;;  %v1823_v57 = vrot.slane %v1738_v55, 4 }
 0x431   : > { %v1804_v21 = vpop.f32.mrf.mxu0 }
 0x432   : > { %v1581_v49 = vpop.f32.mrf.mxu3  ;;  %v1818_v18 = vsel %vm1227_vm2, %v1817_v24, %v1650_v22  ;;  %v1829_v1 = vrot.slane %v1804_v21, 1 }
 0x433   : > { %1584 = vst.msk [vmem:[#allocation3] sm:$0xff] %vm978_vm1, %v1581_v49  ;;  %vm4167_vm1 = vmmov %vm4165_vm7 }
 0x437   : > { %v1760_v58 = vpop.f32.mrf.mxu2  ;;  %v1851_v9 = vpop.f32.mrf.mxu1 }
 0x438   : > { %v1825_v60 = vrot.slane %v1760_v58, 3 }
 0x43a   : > { %v1694_v52 = vpop.f32.mrf.mxu3 }
 0x43b   : > { %v1819_v53 = vrot.slane %v1694_v52, 6 }
 0x43d   : > { %v1820_v28 = vsel %vm1230_vm3, %v1819_v53, %v1818_v18 }
 0x43e   : > { %v1822_v56 = vsel %vm1233_vm4, %v1821_v54, %v1820_v28 }
 0x43f   : > { %v1824_v59 = vsel %vm1236_vm5, %v1823_v57, %v1822_v56 }
 0x440   : > { %v1826_v2 = vsel %vm1239_vm6, %v1825_v60, %v1824_v59 }
 0x442   : > { %v1782_v63 = vpop.f32.mrf.mxu3 }
 0x443   : > { %v1827_v0 = vrot.slane %v1782_v63, 2 }
 0x445   : > { %v1828_v3 = vsel %vm4167_vm1, %v1827_v0, %v1826_v2 }
 0x446   : > { %v1830_v10 = vsel %vm4168_vm10, %v1829_v1, %v1828_v3 }
 0x447   : > { %v1852_v11 = vadd.f32 %v1851_v9, %v1830_v10 }
 0x449   : > { %v1854_v13 = vadd.f32 %v1852_v11, %v1622_v12 }
 0x44b   : > { %v1855_v14 = vmul.f32 0.25, %v1854_v13 }
 0x44d   : > { %v1856_v16 = vsel %vm1273_vm9, %v1855_v14, -inf  ;;  %v1882_v17 = vsel %vm4169_vm11, -1e+30, %v1855_v14 }
 0x44e   : > { %1857 = vmax.xlane.f32.xlu2 %v1856_v16  ;;  %v1883_v23 = vsel %vm1273_vm9, %v1882_v17, -inf }
 0x44f   : > { %1884 = vmax.xlane.f32.xlu1 %v1883_v23 }
 0x468   : > { %1908 = vrot.lane.b32.xlu1 %v3772_v27, %s3384_s30 }
 0x4c1   : > { %v1858_v26 = vpop.xlane.xlu2 %1857 }
 0x4c2   : > { %v1859_v29 = vsub.f32 %v1855_v14, %v1858_v26  ;;  %v1885_v30 = vpop.xlane.xlu1 %1884 }
 0x4c3   : > { %v1886_v31 = vsub.f32 %v1882_v17, %v1885_v30 }
 0x4c4   : > { %v1860_v32 = vmul.f32 1.442695, %v1859_v29 }
 0x4c5   : > { %v1887_v33 = vmul.f32 1.442695, %v1886_v31 }
 0x4c6   : > { %2930 = vpow2.f32 %v1860_v32 }
 0x4c7   : > { %2932 = vpow2.f32 %v1887_v33 }
 0x4cc   : > { %v2931_v34 = vpop.eup %2930 }
 0x4cd   : > { %v2933_v35 = vpop.eup %2932  ;;  %v1862_v36 = vsel %vm1273_vm9, %v2931_v34, 0.0 }
 0x4ce   : > { %1863 = vadd.xlane.f32.xlu0 %v1862_v36  ;;  %v1889_v37 = vsel %vm4170_vm12, 0.0, %v2933_v35 }
 0x4cf   : > { %v1890_v38 = vsel %vm1273_vm9, %v1889_v37, 0.0 }
 0x4d0   : > { %1891 = vadd.xlane.f32.xlu2 %v1890_v38 }
 0x4da   : > { %v1909_v27 = vpop.permute.xlu1 %1908 }
 0x4db   : > { %1929 = vmatpush.msra.mxu2 %v1909_v27  ;;  %v2197_v27 = vld [vmem:[#allocation16 + $0x18] sm:$0xff] }
 0x4dd   : > { %2031 = vmatpush.msrb.mxu2 %v3743_v20 }
 0x4e2   : > { %2902 = vrot.lane.b32.xlu0 %v2901_v41, %s3382_s28  ;;  %v2194_v41 = vld [vmem:[#allocation16] sm:$0xff] }
 0x4e8   : > { %2907 = vrot.lane.b32.xlu2 %v2906_v15, %s3382_s28  ;;  %s4176_s28 = sld [smem:[#allocation48_spill]] }
 0x541   : > { %v1864_v39 = vpop.xlane.xlu0 %1863 }
 0x542   : > { %2934 = vrcp.f32 %v1864_v39  ;;  %v1876_v20 = vand.u32 2147483648, %v1864_v39  ;;  %v1874_v46 = vand.u32 2147483647, %v1864_v39  ;;  %vm1870_vm14 = vweird.f32 %v1864_v39 }
 0x543   : > { %v1892_v40 = vpop.xlane.xlu2 %1891 }
 0x544   : > { %2936 = vrcp.f32 %v1892_v40  ;;  %v1904_v48 = vand.u32 2147483648, %v1892_v40  ;;  %v1902_v7 = vand.u32 2147483647, %v1892_v40  ;;  %v1877_v8 = vor.u32 1.1754944e-38, %v1876_v20  ;;  %v2272_v20 = vld [vmem:[#allocation18] sm:$0xff] }
 0x545   : > { %vm1875_vm8 = vcmp.eq.f32.partialorder %v1874_v46, 8.507059e+37  ;;  %vm1898_vm1 = vweird.f32 %v1892_v40 }
 0x546   : > { %v1905_v50 = vor.u32 1.1754944e-38, %v1904_v48  ;;  %vm1903_vm11 = vcmp.eq.f32.partialorder %v1902_v7, 8.507059e+37  ;;  %v2916_v7 = vld [vmem:[%s4086_s10] ss:$0 sm:$0xff] }
 0x548   : > { %v2935_v61 = vpop.eup %2934 }
 0x549   : > { %v1866_v62 = vmul.f32 %v2935_v61, %v1864_v39  ;;  %vm1871_vm13 = vweird.f32 %v2935_v61  ;;  %v2196_v39 = vld [vmem:[#allocation16 + $0x10] sm:$0xff] }
 0x54a   : > { %v2937_v42 = vpop.eup %2936  ;;  %vm1872_vm7 = vmor %vm1870_vm14, %vm1871_vm13 }
 0x54b   : > { %v1867_v43 = vsub.f32 1.0, %v1866_v62  ;;  %v1894_v44 = vmul.f32 %v2937_v42, %v1892_v40  ;;  %vm1899_vm15 = vweird.f32 %v2937_v42  ;;  %v2908_v60 = vpop.permute.xlu2 %2907  ;;  %v2195_v40 = vld [vmem:[#allocation16 + $0x8] sm:$0xff] }
 0x54c   : > { %vm1900_vm10 = vmor %vm1898_vm1, %vm1899_vm15  ;;  %v2910_v63 = vunpack.i.h.bf16 %v2908_v60  ;;  %v2909_v0 = vunpack.i.l.bf16 %v2908_v60 }
 0x54d   : > { %v1868_v45 = vmul.f32 %v2935_v61, %v1867_v43  ;;  %v1895_v47 = vsub.f32 1.0, %v1894_v44  ;;  %v2274_v43 = vld [vmem:[#allocation18 + $0x10] sm:$0xff]  ;;  %v2273_v44 = vld [vmem:[#allocation18 + $0x8] sm:$0xff] }
 0x54f   : > { %v1869_v5 = vadd.f32 %v2935_v61, %v1868_v45  ;;  %v1896_v6 = vmul.f32 %v2937_v42, %v1895_v47  ;;  %v2915_v45 = vld [vmem:[%s4088_s12] ss:$0 sm:$0xff] }
 0x551   : > { %v1873_v19 = vsel %vm1872_vm7, %v2935_v61, %v1869_v5  ;;  %v1897_v22 = vadd.f32 %v2937_v42, %v1896_v6 }
 0x552   : > { %v1878_v49 = vsel %vm1875_vm8, %v1877_v8, %v1873_v19 }
 0x553   : > { %v1901_v51 = vsel %vm1900_vm10, %v2937_v42, %v1897_v22  ;;  %v1879_v24 = vmul.f32 %v2931_v34, %v1878_v49  ;;  %v2275_v42 = vld [vmem:[#allocation18 + $0x18] sm:$0xff]  ;;  %v3386_v22 = vmov 32.0  }
 0x554   : > { %v1906_v52 = vsel %vm1903_vm11, %v1905_v50, %v1901_v51  ;;  %v2903_v58 = vpop.permute.xlu0 %2902  ;;  %2938 = vrcp.f32 %v3386_v22 }
 0x555   : > { %v1907_v53 = vmul.f32 %v1906_v52, %v1889_v37  ;;  %2726 = vmatmul.msk.f32.vlgmr.msra.gmra.mxu2 %vm1273_vm9, %v1879_v24  ;;  %2725 = vst.msk [vmem:[%s3834_s13 + $0x8] sm:$0xff] %vm1273_vm9, %v1879_v24  ;;  %v2905_v21 = vunpack.i.h.bf16 %v2903_v58  ;;  %v2904_v59 = vunpack.i.l.bf16 %v2903_v58 }
 0x556   : > { %2119 = vmatpush.msra.mxu2 %v3766_v25 }
 0x557   : > { %2727 = vmatmul.msk.f32.vlgmr.msra.gmra.mxu3 %vm1273_vm9, %v1907_v53  ;;  %v1941_v54 = vrot.slane %v1907_v53, 1  ;;  %v1942_v18 = vrot.slane %v1907_v53, 2  ;;  %v1943_v55 = vrot.slane %v1907_v53, 3  ;;  %v1944_v28 = vrot.slane %v1907_v53, 4 }
 0x558   : > { %v1945_v56 = vrot.slane %v1907_v53, 5  ;;  %v1946_v57 = vrot.slane %v1907_v53, 6  ;;  %v1947_v25 = vrot.slane %v1907_v53, 7  ;;  %2180 = vmatpush.msra.mxu3 %v2904_v59 }
 0x559   : > { %2728 = vmatmul.msk.f32.vlgmr.msra.gmra.mxu0 %vm1273_vm9, %v1941_v54  ;;  %2729 = vmatmul.msk.f32.vlgmr.msra.gmra.mxu1 %vm1273_vm9, %v1942_v18 }
 0x55a   : > { %2181 = vmatpush.msra.mxu3 %v2905_v21  ;;  %2217 = vmatpush.msra.mxu0 %v2197_v27  ;;  %v2939_v49 = vpop.eup %2938 }
 0x55b   : > { %2295 = vmatpush.msra.mxu1 %v2275_v42  ;;  %v2232_v50 = vmul.f32 32.0, %v2939_v49 }
 0x55c   : > { %2182 = vmatpush.msra.mxu3 %v2909_v0  ;;  %2218 = vmatpush.msra.mxu0 %v2196_v39 }
 0x55d   : > { %2730 = vmatmul.msk.f32.vlgmr.msrb.gmra.mxu2 %vm1273_vm9, %v1943_v55  ;;  %2296 = vmatpush.msra.mxu1 %v2274_v43  ;;  %v2233_v51 = vsub.f32 1.0, %v2232_v50 }
 0x55e   : > { %2183 = vmatpush.msra.mxu3 %v2910_v63  ;;  %2219 = vmatpush.msra.mxu0 %v2195_v40 }
 0x55f   : > { %2731 = vmatmul.msk.f32.vlgmr.msrb.gmra.mxu3 %vm1273_vm9, %v1944_v28  ;;  %2297 = vmatpush.msra.mxu1 %v2273_v44 }
 0x560   : > { %2220 = vmatpush.msra.mxu0 %v2194_v41 }
 0x561   : > { %2732 = vmatmul.msk.f32.vlgmr.msrb.gmra.mxu0 %vm1273_vm9, %v1945_v56  ;;  %2733 = vmatmul.msk.f32.vlgmr.msrb.gmra.mxu1 %vm1273_vm9, %v1946_v57  ;;  %v2917_v56 = vld [vmem:[%s4173_s7] ss:$0 sm:$0xff] }
 0x562   : > { %2298 = vmatpush.msra.mxu1 %v2272_v20 }
 0x565   : > { %2734 = vmatmul.msk.f32.vlgmr.msra.gmra.mxu2 %vm1273_vm9, %v1947_v25  ;;  %vm4172_vm9 = vcmask 1047559  }
 0x5d6   : > { %v1989_v1 = vpop.f32.mrf.mxu0  ;;  %v2011_v9 = vpop.f32.mrf.mxu1 }
 0x5d7   : > { %v2136_v10 = vrot.slane %v1989_v1, 7  ;;  %v2138_v12 = vrot.slane %v2011_v9, 6 }
 0x5d8   : > { %v1931_v2 = vpop.f32.mrf.mxu2 }
 0x5d9   : > { %1935 = vrot.lane.b32.xlu0 %v1931_v2, %s3385_s24 }
 0x5da   : > { %v1967_v3 = vpop.f32.mrf.mxu3 }
 0x5db   : > { %v2137_v11 = vsel %vm1227_vm2, %v2136_v10, %v1967_v3  ;;  %vm4171_vm2 = vcmask 1046534   ;;  %v2918_v10 = vld [vmem:[%s4174_s4] ss:$0 sm:$0xff] }
 0x5dc   : > { %v2139_v16 = vsel %vm1230_vm3, %v2138_v12, %v2137_v11  ;;  %vm1938_vm3 = vcmask 261248  }
 0x5de   : > { %v2077_v17 = vpop.f32.mrf.mxu0  ;;  %v2099_v31 = vpop.f32.mrf.mxu1 }
 0x5df   : > { %v2144_v30 = vrot.slane %v2077_v17, 3  ;;  %v2146_v34 = vrot.slane %v2099_v31, 2 }
 0x5e0   : > { %v2033_v13 = vpop.f32.mrf.mxu2 }
 0x5e1   : > { %v2140_v14 = vrot.slane %v2033_v13, 5  ;;  %v2921_v13 = vld [vmem:[%s4176_s28] ss:$0 sm:$0xff] }
 0x5e2   : > { %v2055_v23 = vpop.f32.mrf.mxu3 }
 0x5e3   : > { %v2141_v26 = vsel %vm1233_vm4, %v2140_v14, %v2139_v16  ;;  %v2142_v29 = vrot.slane %v2055_v23, 4  ;;  %vm2236_vm4 = vweird.f32 %v2939_v49 }
 0x5e5   : > { %v2143_v32 = vsel %vm1236_vm5, %v2142_v29, %v2141_v26 }
 0x5e6   : > { %v2145_v33 = vsel %vm1239_vm6, %v2144_v30, %v2143_v32 }
 0x5e7   : > { %v2147_v37 = vsel %vm4171_vm2, %v2146_v34, %v2145_v33 }
 0x5e8   : > { %v2121_v35 = vpop.f32.mrf.mxu2 }
 0x5e9   : > { %v2148_v36 = vrot.slane %v2121_v35, 1 }
 0x5eb   : > { %v2149_v38 = vsel %vm4172_vm9, %v2148_v36, %v2147_v37 }
 0x5ec   : > { %2735 = vmatmul.msk.f32.vlgmr.msra.gmra.mxu3 %vm913_vm0, %v2149_v38 }
 0x64b   : > { %v1936_v15 = vpop.permute.xlu0 %1935 }
 0x64c   : > { %1939 = vst.msk [vmem:[#allocation2] sm:$0xff] %vm1938_vm3, %v1936_v15 }
 0x653   : > { %v2193_v61 = vld [vmem:[#allocation2] sm:$0xff] }
 0x654   : > { %2736 = vmatmul.msk.f32.vlgmr.msra.gmra.mxu0 %vm913_vm0, %v2193_v61 }
 0x66f   : > { %v2185_v62 = vpop.f32.mrf.mxu3 }
 0x670   : > { %2189 = vrot.lane.b32.xlu1 %v2185_v62, %s3385_s24  ;;  %s4178_s24 = sld [smem:[#allocation54_spill]] }
 0x676   : > { %s2374_s16 = scalar_lea.hbm %s4178_s24, %s2748_s27  ;;  %s3234_s2 = scalar_lea.hbm %s4178_s24, 32 }
 0x677   : > { %s2377_s21 = sshll.u32 %s2374_s16, 4  ;;  %s2378_s21 = int_to_ptr.hbm [resolvable:$true] %s2377_s21 }
 0x678   : > { %s3228_s19 = sshra.s32 %s2378_s21, 4  ;;  %s3229_s19 = int_to_ptr.hbm [resolvable:$true] %s3228_s19 }
 0x679   : > { %s3230_s18 = scalar_lea.hbm %s3229_s19, 16  ;;  %p3235_p6 = scmp.lt.s32.totalorder %s3229_s19, %s4178_s24 }
 0x67a   : > { %p3231_p1 = scmp.ne.s32.totalorder %s3229_s19, %s3230_s18  ;;  %p3236_p8 = scmp.lt.s32.totalorder %s3234_s2, %s3230_s18 }
 0x67c   : > { %p3232_p3 = pnand %p3231_p1, %p3597_p4  ;;  %p3237_p10 = por %p3236_p8, %p3235_p6 }
 0x67e   : > { %p3233_p5 = pneg %p3232_p3 }
 0x680   : > { %p3238_p11 = pnand %p3237_p10, %p3233_p5 }
 0x6d1   : > { %v2222_v46 = vpop.f32.mrf.mxu0 }
 0x6d2   : > { %v2223_v47 = vadd.f32 %v2915_v45, %v2222_v46 }
 0x6d4   : > { %v2225_v48 = vadd.f32 %v2223_v47, %v3715_v4  ;;  %v2234_v4 = vmul.f32 %v2939_v49, %v2233_v51 }
 0x6d6   : > { %v2228_v5 = vsel %vm913_vm0, %v2225_v48, 0.0  ;;  %v2235_v24 = vadd.f32 %v2939_v49, %v2234_v4 }
 0x6d7   : > { %2229 = vadd.xlane.f32.xlu2 %v2228_v5 }
 0x6d8   : > { %v3961_v52 = vsel %vm2236_vm4, %v2939_v49, %v2235_v24 }
 0x6e2   : > { %v2190_v6 = vpop.permute.xlu1 %2189 }
 0x6e3   : > { %2192 = vst.msk [vmem:[#allocation3] sm:$0xff] %vm1938_vm3, %v2190_v6 }
 0x6ea   : > { %v2266_v8 = vld [vmem:[#allocation3] sm:$0xff] }
 0x6eb   : > { %v2271_v19 = vadd.f32 %v2916_v7, %v2266_v8 }
 0x6ed   : > { %2737 = vmatmul.msk.f32.vlgmr.msra.gmra.mxu1 %vm913_vm0, %v2271_v19 }
 0x74a   : > { %v2230_v53 = vpop.xlane.xlu2 %2229 }
 0x74b   : > { %v2238_v54 = vmul.f32 %v3961_v52, %v2230_v53 }
 0x74d   : > { %v2239_v18 = vsub.f32 %v2225_v48, %v2238_v54 }
 0x74f   : > { %v2240_v55 = vmul.f32 %v2239_v18, %v2239_v18 }
 0x751   : > { %v2241_v28 = vsel %vm913_vm0, %v2240_v55, 0.0 }
 0x752   : > { %2242 = vadd.xlane.f32.xlu1 %v2241_v28 }
 0x76a   : > { %v2300_v57 = vpop.f32.mrf.mxu1 }
 0x76b   : > { %v2301_v25 = vadd.f32 %v2917_v56, %v2300_v57 }
 0x76d   : > { %v2305_v58 = vsel %vm913_vm0, %v2301_v25, 0.0 }
 0x76e   : > { %2306 = vadd.xlane.f32.xlu0 %v2305_v58 }
 0x7c5   : > { %v2243_v21 = vpop.xlane.xlu1 %2242 }
 0x7c6   : > { %v2244_v59 = vmul.f32 %v2243_v21, %v3961_v52 }
 0x7c8   : > { %v2245_v60 = vadd.f32 1e-05, %v2244_v59 }
 0x7ca   : > { %2940 = vrsqrt.f32 %v2245_v60  ;;  %vm2252_vm6 = vweird.f32 %v2245_v60 }
 0x7d0   : > { %v2941_v63 = vpop.eup %2940 }
 0x7d1   : > { %v2247_v0 = vmul.f32 %v2941_v63, %v2245_v60  ;;  %vm2253_vm5 = vweird.f32 %v2941_v63 }
 0x7d2   : > { %vm2254_vm12 = vmor %vm2252_vm6, %vm2253_vm5 }
 0x7d3   : > { %v2248_v1 = vmul.f32 %v2941_v63, %v2247_v0 }
 0x7d5   : > { %v2249_v2 = vmul.f32 0.5, %v2248_v1 }
 0x7d7   : > { %v2250_v3 = vsub.f32 1.5, %v2249_v2 }
 0x7d9   : > { %v2251_v9 = vmul.f32 %v2941_v63, %v2250_v3 }
 0x7db   : > { %v2255_v11 = vsel %vm2254_vm12, %v2941_v63, %v2251_v9 }
 0x7dc   : > { %v2256_v12 = vmul.f32 %v2255_v11, %v2239_v18 }
 0x7de   : > { %v2260_v14 = vmul.f32 %v2918_v10, %v2256_v12 }
 0x7e0   : > { %v2264_v16 = vadd.f32 %v2921_v13, %v2260_v14 }
 0x7e1   : > { %v2307_v17 = vpop.xlane.xlu0 %2306 }
 0x7e2   : > { %v2308_v23 = vmul.f32 %v2307_v17, %v3961_v52  ;;  %2265 = vst.msk [vmem:[%s879_s17] sm:$0xff] %vm913_vm0, %v2264_v16 }
 0x7e4   : > { %v3981_v26 = vsub.f32 %v2301_v25, %v2308_v23 }
 0x7e6   : > { %v2310_v29 = vmul.f32 %v3981_v26, %v3981_v26 }
 0x7e8   : > { %v2311_v30 = vsel %vm913_vm0, %v2310_v29, 0.0 }
 0x7e9   : > { %2312 = vadd.xlane.f32.xlu2 %v2311_v30 }
 0x7ea   : > { %3241 = shalt.err (!%p3238_p11)
}
 0x7eb   : > { %s3387_s29 = smov 128   ;;  %s3388_s22 = smov 8  }
 0x7ec   : > { %2780 = dma.vmem_to_hbm [thread:$0]  (%p3597_p4), %s2376_s23, 256, %s2378_s21, %s3993_s5, %s3387_s29, %s3387_s29, %s3388_s22  }
 0x7ed   : > { %s2741_s13 = sshll.u32 %s4175_s26, 3  ;;  %s4179_s27 = sld [smem:[#allocation53_spill]] }
 0x7ee   : > { %s2360_s16 = sshll.u32 %s879_s17, 4  ;;  %s2337_s18 = scalar_lea.sflag [#allocation6], %s3681_s9  ;;  %s2361_s16 = int_to_ptr.vmem [resolvable:$true] %s2360_s16 }
 0x7f3   : > { %s4180_s1 = smov %s4179_s27  ;;  %s2358_s30 = scalar_lea.hbm %s4179_s27, %s2741_s13 }
 0x7f4   : > { %s2362_s19 = sshll.u32 %s2358_s30, 4  ;;  %s3262_s2 = scalar_lea.hbm %s4180_s1, 16  ;;  %s2363_s19 = int_to_ptr.hbm [resolvable:$true] %s2362_s19 }
 0x7f5   : > { %s3256_s7 = sshra.s32 %s2363_s19, 4  ;;  %s3257_s7 = int_to_ptr.hbm [resolvable:$true] %s3256_s7 }
 0x7f6   : > { %s3258_s20 = scalar_lea.hbm %s3257_s7, 8  ;;  %p3263_p2 = scmp.lt.s32.totalorder %s3257_s7, %s4180_s1 }
 0x7f7   : > { %p3259_p12 = scmp.ne.s32.totalorder %s3257_s7, %s3258_s20  ;;  %p3264_p7 = scmp.lt.s32.totalorder %s3262_s2, %s3258_s20 }
 0x7f9   : > { %p3260_p13 = pnand %p3259_p12, %p3597_p4  ;;  %p3265_p1 = por %p3264_p7, %p3263_p2 }
 0x7fb   : > { %p3261_p0 = pneg %p3260_p13 }
 0x7fd   : > { %p3266_p3 = pnand %p3265_p1, %p3261_p0 }
 0x7ff   : > { %3269 = shalt.err (!%p3266_p3)
}
 0x800   : > { %2779 = dma.vmem_to_hbm [thread:$0]  (%p3597_p4), %s2361_s16, 128, %s2363_s19, %s2337_s18  }
 0x801   : > { %s4181_s29 = sld [smem:[#allocation51_spill]]  ;;  %s893_s20 = scalar_lea.vmem [#allocation22], %s3684_s15 }
 0x802   : > { %s4182_s28 = sld [smem:[#allocation55_spill]]  ;;  %s2393_s23 = sshll.u32 %s893_s20, 4  ;;  %s2394_s23 = int_to_ptr.vmem [resolvable:$true] %s2393_s23 }
 0x803   : > { %s4184_s18 = sld [smem:[#allocation52_spill]] }
 0x807   : > { %v2919_v39 = vld [vmem:[%s4181_s29] ss:$0 sm:$0xff] }
 0x808   : > { %s4183_s30 = smov %s4182_s28  ;;  %s2391_s27 = scalar_lea.hbm %s4182_s28, %s2741_s13 }
 0x809   : > { %v2920_v41 = vld [vmem:[%s4184_s18] ss:$0 sm:$0xff]  ;;  %s2395_s7 = sshll.u32 %s2391_s27, 4  ;;  %s3290_s4 = scalar_lea.hbm %s4183_s30, 16  ;;  %s2396_s7 = int_to_ptr.hbm [resolvable:$true] %s2395_s7 }
 0x80a   : > { %s3284_s26 = sshra.s32 %s2396_s7, 4  ;;  %s3285_s26 = int_to_ptr.hbm [resolvable:$true] %s3284_s26 }
 0x80b   : > { %s3286_s13 = scalar_lea.hbm %s3285_s26, 8  ;;  %p3291_p10 = scmp.lt.s32.totalorder %s3285_s26, %s4183_s30 }
 0x80c   : > { %p3287_p5 = scmp.ne.s32.totalorder %s3285_s26, %s3286_s13  ;;  %p3292_p11 = scmp.lt.s32.totalorder %s3290_s4, %s3286_s13 }
 0x80e   : > { %p3288_p6 = pnand %p3287_p5, %p3597_p4  ;;  %p3293_p12 = por %p3292_p11, %p3291_p10 }
 0x810   : > { %p3289_p8 = pneg %p3288_p6 }
 0x812   : > { %p3294_p13 = pnand %p3293_p12, %p3289_p8 }
 0x85c   : > { %v2313_v31 = vpop.xlane.xlu2 %2312 }
 0x85d   : > { %v2314_v32 = vmul.f32 %v2313_v31, %v3961_v52 }
 0x85f   : > { %v2315_v33 = vadd.f32 1e-05, %v2314_v32 }
 0x861   : > { %2942 = vrsqrt.f32 %v2315_v33  ;;  %vm2322_vm14 = vweird.f32 %v2315_v33 }
 0x867   : > { %v2943_v34 = vpop.eup %2942 }
 0x868   : > { %v2317_v35 = vmul.f32 %v2943_v34, %v2315_v33  ;;  %vm2323_vm13 = vweird.f32 %v2943_v34 }
 0x869   : > { %vm2324_vm15 = vmor %vm2322_vm14, %vm2323_vm13 }
 0x86a   : > { %v2318_v36 = vmul.f32 %v2943_v34, %v2317_v35 }
 0x86c   : > { %v2319_v37 = vmul.f32 0.5, %v2318_v36 }
 0x86e   : > { %v2320_v38 = vsub.f32 1.5, %v2319_v37 }
 0x870   : > { %v2321_v27 = vmul.f32 %v2943_v34, %v2320_v38 }
 0x872   : > { %v2325_v40 = vsel %vm2324_vm15, %v2943_v34, %v2321_v27 }
 0x873   : > { %v2326_v15 = vmul.f32 %v2325_v40, %v3981_v26 }
 0x875   : > { %v2330_v61 = vmul.f32 %v2919_v39, %v2326_v15 }
 0x877   : > { %v2334_v62 = vadd.f32 %v2920_v41, %v2330_v61 }
 0x879   : > { %2335 = vst.msk [vmem:[%s893_s20] sm:$0xff] %vm913_vm0, %v2334_v62 }
 0x87a   : > { %3297 = shalt.err (!%p3294_p13)
}
 0x87b   : > { %2781 = dma.vmem_to_hbm [thread:$0]  (%p3597_p4), %s2394_s23, 128, %s2396_s7, %s3993_s5  }
 0x87c PF: > { %s4185_s9 = sld [smem:[#allocation30_spill]] }
 0x87d   : > { %s4187_s29 = sld [smem:[#allocation33_spill]] }
 0x882   : > { %s2407_s22 = sand.u32 1, %s4185_s9  }
 0x883   : > { %p4188_p0 = scmp.ge.s32.totalorder %s4187_s29, 2  ;;  %s2408_s14 = scalar_lea.sflag [#allocation6], %s2407_s22 }
 0x885   : > { %p2815_p2 = pnand %p4188_p0, %p3605_p9 }
 0x887   : > { %p2816_p7 = pneg %p2815_p2 }
 0x889   : > { %3343 = dma.done.wait (%p2816_p7), %s2408_s14, 128  }
 0x88a   : > { %3345 = vsyncadd (%p2816_p7), %s2408_s14, 4294967168  ;;  %s4189_s28 = sadd.s32 4294967294, %s4187_s29  }
 0x88b   : > { %s2417_s27 = sand.u32 1, %s4189_s28  }
 0x88c   : > { %s2418_s16 = scalar_lea.sflag [#allocation21], %s2417_s27 }
 0x88d   : > { %3347 = dma.done.wait (%p2816_p7), %s2418_s16, 384  }
 0x88e   : > { %3349 = vsyncadd (%p2816_p7), %s2418_s16, 4294966912  ;;  %s47_s28 = sadd.s32 1, %s4187_s29   ;;  %s4190_s11 = sld [smem:[#allocation31_spill]] }
 0x88f   : > { %p44_p4 = scmp.ge.s32.totalorder %s47_s28, 4   ;;  %s4191_s26 = sld [smem:[#allocation36_spill]] }
 0x890   : > { %s4192_s5 = sld [smem:[#allocation34_spill]]  ;;  %s4193_s2 = smov %s3356_s25 }
 0x891   : > { %s4195_s27 = smov %s3368_s3 }
 0x892   :  { %46 = sbr.rel (!%p44_p4) target bundleno = 32 (0x20), region = 222 }
 0x894   : > { %s4194_s25 = smov %s4190_s11 }
 0x896   : > { %s4196_s3 = smov %s4192_s5 }
 0x897   :  { %2434 = vsyncpa [#allocation5], 1 }
 0x898   :  { %2436 = vsyncpa [#allocation5 + $0x1], 1 }
 0x899   :  { %2437 = vsyncpa [#allocation8], 1 }
 0x89a   :  { %2439 = vsyncpa [#allocation8 + $0x1], 1 }
 0x89b   :  { %2440 = vsyncpa [#allocation11], 1 }
 0x89c   :  { %2441 = vsyncpa [#allocation14], 1 }
 0x89d   :  { %2442 = vsyncpa [#allocation17], 1 }
 0x89e   :  { %2443 = vsyncpa [#allocation6], 1 }
 0x89f   :  { %2445 = vsyncpa [#allocation6 + $0x1], 1 }
 0x8a0   :  { %2446 = vsyncpa [#allocation21], 1 }
 0x8a1   :  { %2448 = vsyncpa [#allocation21 + $0x1], 1 }

</bundles_post_ra>
